<compile_context>
chip_gen: v7x
topology: tpu7x:2x2x1
jax: 0.10.0
libtpu: 0.0.40
codegen_flags: <defaults>
</compile_context>

<pallas_src>
import math

import jax
import jax.numpy as jnp
from jax.experimental import pallas as pl
from jax.experimental.pallas import tpu as pltpu

_LANE = 128
_VMEM = pl.BlockSpec(memory_space=pltpu.MemorySpace.VMEM)


def _round_up(x, m):
    return ((x + m - 1) // m) * m


# ----------------------------------------------------------------------------
# Fused kernel: top-k gather (one-hot matmul) + single-step GRU + GCNConv.
#   X_tilde = onehot(perm) * vals @ X
#   gi_g = X_tilde @ Wih_g + b_ih_g ; gh_g = H0 @ Whh_g + b_hh_g   (g = r,z,n)
#   r = sigmoid(gi_r+gh_r); z = sigmoid(gi_z+gh_z); n = tanh(gi_n + r*gh_n)
#   H1 = (1-z)*n + z*H0
#   Y  = A_norm @ (X @ H1)
# ----------------------------------------------------------------------------
def _fused_kernel(perm_ref, vals_ref, x_ref, a_ref, h0_ref,
                  wih_ref, whh_ref, bih_ref, bhh_ref,
                  h1_ref, y_ref):
    Cp = h0_ref.shape[1]
    N = x_ref.shape[0]

    x = x_ref[...]                       # [N, Cp]  channel-padded node features
    h0 = h0_ref[...]                     # [Cp, Cp] current evolved weight

    # --- TopKPooling gather: X_tilde[i] = vals[i] * X[perm[i]] --------------
    # Build a scaled one-hot selection matrix and do the gather on the MXU.
    # perm is padded with -1 (never matches) so rows >= k are exactly zero.
    node_ids = jax.lax.broadcasted_iota(jnp.int32, (Cp, N), 1)
    sel = jnp.where(node_ids == perm_ref[...], vals_ref[...], 0.0)    # [Cp, N]
    xt = jnp.dot(sel, x, preferred_element_type=jnp.float32)          # [Cp, Cp]

    # --- single-step GRU, gate-separated weights (no intra-vreg slicing) ----
    def _gates(g):
        gi = jnp.dot(xt, wih_ref[g], preferred_element_type=jnp.float32) + bih_ref[g]
        gh = jnp.dot(h0, whh_ref[g], preferred_element_type=jnp.float32) + bhh_ref[g]
        return gi, gh

    gi_r, gh_r = _gates(0)
    gi_z, gh_z = _gates(1)
    gi_n, gh_n = _gates(2)
    r = jax.nn.sigmoid(gi_r + gh_r)
    z = jax.nn.sigmoid(gi_z + gh_z)
    n = jnp.tanh(gi_n + r * gh_n)
    h1 = (1.0 - z) * n + z * h0          # evolved GCN weight, [Cp, Cp]
    h1_ref[...] = h1

    # --- GCNConv_Fixed_W: Y = A_norm @ (X @ H1) ------------------------------
    # TODO(synk): for production-size N, tile A_norm/X/Y over a ("parallel",)
    # row grid (v7x dual-TC + VMEM limits) and cast X/A_norm to bf16 for the
    # MXU; at N=64 the whole-array f32 blocks are the right choice.
    xw = jnp.dot(x, h1, preferred_element_type=jnp.float32)            # [N, Cp]
    y_ref[...] = jnp.dot(a_ref[...], xw, preferred_element_type=jnp.float32)


def _fused_call(perm_pad, vals_pad, X_pad, A_norm, H0_pad, wih, whh, bih, bhh):
    N, Cp = X_pad.shape
    return pl.pallas_call(
        _fused_kernel,
        out_shape=(jax.ShapeDtypeStruct((Cp, Cp), jnp.float32),   # H1 (evolved W)
                   jax.ShapeDtypeStruct((N, Cp), jnp.float32)),   # Y  (padded)
        in_specs=[_VMEM] * 9,
        out_specs=(_VMEM, _VMEM),
        # carried GRU hidden state (input 4 = H0) aliases the H1 output so the
        # recurrent weight does not allocate a fresh HBM buffer every step.
        input_output_aliases={4: 0},
    )(perm_pad, vals_pad, X_pad, A_norm, H0_pad, wih, whh, bih, bhh)


# ----------------------------------------------------------------------------
# Glue (plain JAX): dense GCN normalization and data-dependent top-k.
# ----------------------------------------------------------------------------
def gcn_norm_dense(edge_index, edge_weight, num_nodes, improved=False):
    """D^{-1/2} (A + I) D^{-1/2} as a dense [N, N] matrix, A[target, source]."""
    src, dst = edge_index[0], edge_index[1]
    fill = 2.0 if improved else 1.0
    A = jnp.zeros((num_nodes, num_nodes), jnp.float32)
    A = A.at[dst, src].add(edge_weight)                     # aggregate at target
    A = A + fill * jnp.eye(num_nodes, dtype=jnp.float32)    # add self-loops
    deg = jnp.sum(A, axis=1)
    dinv = jnp.where(deg > 0, jax.lax.rsqrt(deg), 0.0)
    return dinv[:, None] * A * dinv[None, :]


def evolve_gcnh_forward(params, X, edge_index, edge_weight=None,
                        weight_state=None, A_norm=None):
    """Returns (Y, new_weight_state) matching EvolveGCNH.forward semantics.

    new_weight_state is the channel-padded [Cp, Cp] evolved weight; feed it
    back as `weight_state` on the next timestep.
    """
    N, C = X.shape
    Cp = params["wih"].shape[-1]
    k = int(math.ceil(params["ratio"] * N))                 # == C for this layer

    # 1) TopKPooling score in plain JAX (XLA fuses; a dedicated pallas_call
    #    for this [N,C] reduction was pure launch overhead).
    p = params["pool_w"]                                    # [1, C]
    p_norm = jnp.maximum(jnp.sqrt(jnp.sum(p * p)), 1e-16)   # clamp vs all-zero p
    scores = jnp.tanh(jnp.sum(X * p, axis=-1) / p_norm)     # [N]

    # 2) data-dependent top-k selection stays in plain JAX; only the tiny
    #    perm/vals vectors enter the kernel (the gather itself is fused).
    # TODO(synk): jax.lax.top_k tie-breaking may differ from torch.topk on ties.
    vals, perm = jax.lax.top_k(scores, k)
    perm_pad = jnp.full((Cp, 1), -1, jnp.int32).at[:k, 0].set(perm.astype(jnp.int32))
    vals_pad = jnp.zeros((Cp, 1), jnp.float32).at[:k, 0].set(vals)

    # 3) pad channels to a full 128-lane width (lane-dense MXU/VPU work and
    #    unmasked output stores); zero padding keeps the real block exact.
    X_pad = jnp.pad(X.astype(jnp.float32), ((0, 0), (0, Cp - C)))

    # 4) dense symmetric normalization (hoist/cache when the graph is static).
    if A_norm is None:
        if edge_weight is None:
            edge_weight = jnp.ones((edge_index.shape[1],), jnp.float32)
        A_norm = gcn_norm_dense(edge_index, edge_weight, N)

    H0 = params["initial_weight"] if weight_state is None else weight_state

    H1, Y_pad = _fused_call(perm_pad, vals_pad, X_pad, A_norm, H0,
                            params["wih"], params["whh"],
                            params["bih"], params["bhh"])
    return Y_pad[:, :C], H1


# ----------------------------------------------------------------------------
# Deterministic parameter construction (already gate-split + channel-padded).
# ----------------------------------------------------------------------------
def make_params(key, N, C, Cp):
    ks = jax.random.split(key, 10)
    glorot = math.sqrt(6.0 / (C + C))
    bound = 1.0 / math.sqrt(C)                              # PyTorch GRU init scale

    def pad2(w):                                            # [C, C] -> [Cp, Cp]
        return jnp.pad(w, ((0, Cp - C), (0, Cp - C)))

    # Gate order (r, z, n), stored pre-transposed so x @ wih[g] == x @ W_ih_g^T.
    wih = jnp.stack([pad2(jax.random.uniform(ks[i], (C, C), jnp.float32, -bound, bound))
                     for i in range(3)])                    # [3, Cp, Cp]
    whh = jnp.stack([pad2(jax.random.uniform(ks[3 + i], (C, C), jnp.float32, -bound, bound))
                     for i in range(3)])                    # [3, Cp, Cp]
    bih = jnp.pad(jax.random.uniform(ks[6], (3, 1, C), jnp.float32, -bound, bound),
                  ((0, 0), (0, 0), (0, Cp - C)))            # [3, 1, Cp]
    bhh = jnp.pad(jax.random.uniform(ks[7], (3, 1, C), jnp.float32, -bound, bound),
                  ((0, 0), (0, 0), (0, Cp - C)))            # [3, 1, Cp]

    return {
        "ratio": C / N,
        "pool_w": jax.random.uniform(ks[8], (1, C), jnp.float32, -glorot, glorot),
        # squeezed + channel-padded version of the [1, C, C] initial_weight.
        "initial_weight": pad2(jax.random.uniform(ks[9], (C, C), jnp.float32,
                                                  -glorot, glorot)),
        "wih": wih, "whh": whh, "bih": bih, "bhh": bhh,
    }


if __name__ == "__main__":
    N, C, E = 64, 32, 256                                   # num_of_nodes, in_channels, edges
    Cp = _round_up(C, _LANE)

    key = jax.random.PRNGKey(0)
    kx, ke1, ke2, kp = jax.random.split(key, 4)

    X = jax.random.normal(kx, (N, C), jnp.float32)
    src = jax.random.randint(ke1, (E,), 0, N)
    dst = jax.random.randint(ke2, (E,), 0, N)
    dst = jnp.where(dst == src, (dst + 1) % N, dst)         # no pre-existing self-loops
    edge_index = jnp.stack([src, dst]).astype(jnp.int32)

    params = make_params(kp, N, C, Cp)

    # Static graph in this demo -> build the dense normalized adjacency once
    # and reuse it across timesteps instead of rebuilding it per forward.
    A_norm = gcn_norm_dense(edge_index, jnp.ones((E,), jnp.float32), N)

    Y1, W1 = evolve_gcnh_forward(params, X, edge_index, A_norm=A_norm)
    Y2, W2 = evolve_gcnh_forward(params, X, edge_index, A_norm=A_norm,
                                 weight_state=W1)           # second recurrent step
    jax.block_until_ready((Y1, Y2, W2))

    assert Y1.shape == (N, C) and Y2.shape == (N, C)
    assert W1.shape == (Cp, Cp) and W2.shape == (Cp, Cp)
    print("KERNEL_OK")
</pallas_src>

<mosaic_0001>
module attributes {stable_mosaic.version = 11 : i64} {
  func.func @_fused_kernel(%arg0: memref<128x1xi32, #tpu.memory_space<vmem>>, %arg1: memref<128x1xf32, #tpu.memory_space<vmem>>, %arg2: memref<64x128xf32, #tpu.memory_space<vmem>>, %arg3: memref<64x64xf32, #tpu.memory_space<vmem>>, %arg4: memref<128x128xf32, #tpu.memory_space<vmem>>, %arg5: memref<3x128x128xf32, #tpu.memory_space<vmem>>, %arg6: memref<3x128x128xf32, #tpu.memory_space<vmem>>, %arg7: memref<3x1x128xf32, #tpu.memory_space<vmem>>, %arg8: memref<3x1x128xf32, #tpu.memory_space<vmem>>, %arg9: memref<128x128xf32, #tpu.memory_space<vmem>>, %arg10: memref<64x128xf32, #tpu.memory_space<vmem>>) attributes {dimension_semantics = [], scalar_prefetch = 0 : i64, scratch_operands = 0 : i64, tpu.core_type = #tpu.core_type<tc>} {
    %c0 = arith.constant 0 : index
    %c0_0 = arith.constant 0 : index
    %0 = vector.load %arg2[%c0, %c0_0] : memref<64x128xf32, #tpu.memory_space<vmem>>, vector<64x128xf32>
    %c0_1 = arith.constant 0 : index
    %c0_2 = arith.constant 0 : index
    %1 = vector.load %arg4[%c0_1, %c0_2] : memref<128x128xf32, #tpu.memory_space<vmem>>, vector<128x128xf32>
    %2 = tpu.iota {dimensions = array<i32: 1>} : vector<128x64xi32>
    %c0_3 = arith.constant 0 : index
    %c0_4 = arith.constant 0 : index
    %3 = vector.load %arg0[%c0_3, %c0_4] : memref<128x1xi32, #tpu.memory_space<vmem>>, vector<128x1xi32>
    %4 = vector.broadcast %3 : vector<128x1xi32> to vector<128x64xi32>
    %5 = arith.cmpi eq, %2, %4 : vector<128x64xi32>
    %c0_5 = arith.constant 0 : index
    %c0_6 = arith.constant 0 : index
    %6 = vector.load %arg1[%c0_5, %c0_6] : memref<128x1xf32, #tpu.memory_space<vmem>>, vector<128x1xf32>
    %cst = arith.constant 0.000000e+00 : f32
    %7 = vector.shape_cast %6 : vector<128x1xf32> to vector<128x1xf32>
    %8 = vector.broadcast %7 : vector<128x1xf32> to vector<128x64xf32>
    %9 = vector.broadcast %cst : f32 to vector<128x64xf32>
    %10 = arith.select %5, %8, %9 : vector<128x64xi1>, vector<128x64xf32>
    %cst_7 = arith.constant dense<0.000000e+00> : vector<128x128xf32>
    %11 = tpu.matmul %10, %0, %cst_7 {dimension_numbers = #tpu.dot_dimension_numbers<[1], [0], [0], [1], [0, 0, 1, 1], [], []>} : vector<128x64xf32>, vector<64x128xf32>, vector<128x128xf32> -> vector<128x128xf32>
    %c0_8 = arith.constant 0 : index
    %c0_9 = arith.constant 0 : index
    %c0_10 = arith.constant 0 : index
    %12 = vector.load %arg5[%c0_8, %c0_9, %c0_10] : memref<3x128x128xf32, #tpu.memory_space<vmem>>, vector<1x128x128xf32>
    %13 = vector.shape_cast %12 : vector<1x128x128xf32> to vector<128x128xf32>
    %cst_11 = arith.constant dense<0.000000e+00> : vector<128x128xf32>
    %14 = tpu.matmul %11, %13, %cst_11 {dimension_numbers = #tpu.dot_dimension_numbers<[1], [0], [0], [1], [0, 0, 1, 1], [], []>} : vector<128x128xf32>, vector<128x128xf32>, vector<128x128xf32> -> vector<128x128xf32>
    %c0_12 = arith.constant 0 : index
    %c0_13 = arith.constant 0 : index
    %c0_14 = arith.constant 0 : index
    %15 = vector.load %arg7[%c0_12, %c0_13, %c0_14] : memref<3x1x128xf32, #tpu.memory_space<vmem>>, vector<1x1x128xf32>
    %16 = vector.shape_cast %15 : vector<1x1x128xf32> to vector<1x128xf32>
    %17 = vector.broadcast %16 : vector<1x128xf32> to vector<128x128xf32>
    %18 = arith.addf %14, %17 : vector<128x128xf32>
    %c0_15 = arith.constant 0 : index
    %c0_16 = arith.constant 0 : index
    %c0_17 = arith.constant 0 : index
    %19 = vector.load %arg6[%c0_15, %c0_16, %c0_17] : memref<3x128x128xf32, #tpu.memory_space<vmem>>, vector<1x128x128xf32>
    %20 = vector.shape_cast %19 : vector<1x128x128xf32> to vector<128x128xf32>
    %cst_18 = arith.constant dense<0.000000e+00> : vector<128x128xf32>
    %21 = tpu.matmul %1, %20, %cst_18 {dimension_numbers = #tpu.dot_dimension_numbers<[1], [0], [0], [1], [0, 0, 1, 1], [], []>} : vector<128x128xf32>, vector<128x128xf32>, vector<128x128xf32> -> vector<128x128xf32>
    %c0_19 = arith.constant 0 : index
    %c0_20 = arith.constant 0 : index
    %c0_21 = arith.constant 0 : index
    %22 = vector.load %arg8[%c0_19, %c0_20, %c0_21] : memref<3x1x128xf32, #tpu.memory_space<vmem>>, vector<1x1x128xf32>
    %23 = vector.shape_cast %22 : vector<1x1x128xf32> to vector<1x128xf32>
    %24 = vector.broadcast %23 : vector<1x128xf32> to vector<128x128xf32>
    %25 = arith.addf %21, %24 : vector<128x128xf32>
    %c1 = arith.constant 1 : index
    %c0_22 = arith.constant 0 : index
    %c0_23 = arith.constant 0 : index
    %26 = vector.load %arg5[%c1, %c0_22, %c0_23] : memref<3x128x128xf32, #tpu.memory_space<vmem>>, vector<1x128x128xf32>
    %27 = vector.shape_cast %26 : vector<1x128x128xf32> to vector<128x128xf32>
    %cst_24 = arith.constant dense<0.000000e+00> : vector<128x128xf32>
    %28 = tpu.matmul %11, %27, %cst_24 {dimension_numbers = #tpu.dot_dimension_numbers<[1], [0], [0], [1], [0, 0, 1, 1], [], []>} : vector<128x128xf32>, vector<128x128xf32>, vector<128x128xf32> -> vector<128x128xf32>
    %c1_25 = arith.constant 1 : index
    %c0_26 = arith.constant 0 : index
    %c0_27 = arith.constant 0 : index
    %29 = vector.load %arg7[%c1_25, %c0_26, %c0_27] : memref<3x1x128xf32, #tpu.memory_space<vmem>>, vector<1x1x128xf32>
    %30 = vector.shape_cast %29 : vector<1x1x128xf32> to vector<1x128xf32>
    %31 = vector.broadcast %30 : vector<1x128xf32> to vector<128x128xf32>
    %32 = arith.addf %28, %31 : vector<128x128xf32>
    %c1_28 = arith.constant 1 : index
    %c0_29 = arith.constant 0 : index
    %c0_30 = arith.constant 0 : index
    %33 = vector.load %arg6[%c1_28, %c0_29, %c0_30] : memref<3x128x128xf32, #tpu.memory_space<vmem>>, vector<1x128x128xf32>
    %34 = vector.shape_cast %33 : vector<1x128x128xf32> to vector<128x128xf32>
    %cst_31 = arith.constant dense<0.000000e+00> : vector<128x128xf32>
    %35 = tpu.matmul %1, %34, %cst_31 {dimension_numbers = #tpu.dot_dimension_numbers<[1], [0], [0], [1], [0, 0, 1, 1], [], []>} : vector<128x128xf32>, vector<128x128xf32>, vector<128x128xf32> -> vector<128x128xf32>
    %c1_32 = arith.constant 1 : index
    %c0_33 = arith.constant 0 : index
    %c0_34 = arith.constant 0 : index
    %36 = vector.load %arg8[%c1_32, %c0_33, %c0_34] : memref<3x1x128xf32, #tpu.memory_space<vmem>>, vector<1x1x128xf32>
    %37 = vector.shape_cast %36 : vector<1x1x128xf32> to vector<1x128xf32>
    %38 = vector.broadcast %37 : vector<1x128xf32> to vector<128x128xf32>
    %39 = arith.addf %35, %38 : vector<128x128xf32>
    %c2 = arith.constant 2 : index
    %c0_35 = arith.constant 0 : index
    %c0_36 = arith.constant 0 : index
    %40 = vector.load %arg5[%c2, %c0_35, %c0_36] : memref<3x128x128xf32, #tpu.memory_space<vmem>>, vector<1x128x128xf32>
    %41 = vector.shape_cast %40 : vector<1x128x128xf32> to vector<128x128xf32>
    %cst_37 = arith.constant dense<0.000000e+00> : vector<128x128xf32>
    %42 = tpu.matmul %11, %41, %cst_37 {dimension_numbers = #tpu.dot_dimension_numbers<[1], [0], [0], [1], [0, 0, 1, 1], [], []>} : vector<128x128xf32>, vector<128x128xf32>, vector<128x128xf32> -> vector<128x128xf32>
    %c2_38 = arith.constant 2 : index
    %c0_39 = arith.constant 0 : index
    %c0_40 = arith.constant 0 : index
    %43 = vector.load %arg7[%c2_38, %c0_39, %c0_40] : memref<3x1x128xf32, #tpu.memory_space<vmem>>, vector<1x1x128xf32>
    %44 = vector.shape_cast %43 : vector<1x1x128xf32> to vector<1x128xf32>
    %45 = vector.broadcast %44 : vector<1x128xf32> to vector<128x128xf32>
    %46 = arith.addf %42, %45 : vector<128x128xf32>
    %c2_41 = arith.constant 2 : index
    %c0_42 = arith.constant 0 : index
    %c0_43 = arith.constant 0 : index
    %47 = vector.load %arg6[%c2_41, %c0_42, %c0_43] : memref<3x128x128xf32, #tpu.memory_space<vmem>>, vector<1x128x128xf32>
    %48 = vector.shape_cast %47 : vector<1x128x128xf32> to vector<128x128xf32>
    %cst_44 = arith.constant dense<0.000000e+00> : vector<128x128xf32>
    %49 = tpu.matmul %1, %48, %cst_44 {dimension_numbers = #tpu.dot_dimension_numbers<[1], [0], [0], [1], [0, 0, 1, 1], [], []>} : vector<128x128xf32>, vector<128x128xf32>, vector<128x128xf32> -> vector<128x128xf32>
    %c2_45 = arith.constant 2 : index
    %c0_46 = arith.constant 0 : index
    %c0_47 = arith.constant 0 : index
    %50 = vector.load %arg8[%c2_45, %c0_46, %c0_47] : memref<3x1x128xf32, #tpu.memory_space<vmem>>, vector<1x1x128xf32>
    %51 = vector.shape_cast %50 : vector<1x1x128xf32> to vector<1x128xf32>
    %52 = vector.broadcast %51 : vector<1x128xf32> to vector<128x128xf32>
    %53 = arith.addf %49, %52 : vector<128x128xf32>
    %54 = arith.addf %18, %25 : vector<128x128xf32>
    %55 = arith.negf %54 : vector<128x128xf32>
    %56 = math.exp %55 : vector<128x128xf32>
    %cst_48 = arith.constant 1.000000e+00 : f32
    %57 = vector.broadcast %cst_48 : f32 to vector<128x128xf32>
    %58 = arith.addf %57, %56 : vector<128x128xf32>
    %59 = arith.divf %57, %58 : vector<128x128xf32>
    %60 = arith.addf %32, %39 : vector<128x128xf32>
    %61 = arith.negf %60 : vector<128x128xf32>
    %62 = math.exp %61 : vector<128x128xf32>
    %cst_49 = arith.constant 1.000000e+00 : f32
    %63 = vector.broadcast %cst_49 : f32 to vector<128x128xf32>
    %64 = arith.addf %63, %62 : vector<128x128xf32>
    %65 = arith.divf %63, %64 : vector<128x128xf32>
    %66 = arith.mulf %59, %53 : vector<128x128xf32>
    %67 = arith.addf %46, %66 : vector<128x128xf32>
    %68 = math.tanh %67 : vector<128x128xf32>
    %cst_50 = arith.constant 1.000000e+00 : f32
    %69 = vector.broadcast %cst_50 : f32 to vector<128x128xf32>
    %70 = arith.subf %69, %65 : vector<128x128xf32>
    %71 = arith.mulf %70, %68 : vector<128x128xf32>
    %72 = arith.mulf %65, %1 : vector<128x128xf32>
    %73 = arith.addf %71, %72 : vector<128x128xf32>
    %c0_51 = arith.constant 0 : index
    %c0_52 = arith.constant 0 : index
    %74 = vector.load %arg9[%c0_51, %c0_52] : memref<128x128xf32, #tpu.memory_space<vmem>>, vector<128x128xf32>
    tpu.vector_store %arg9[%c0_51, %c0_52], %73 {strides = array<i32>} : memref<128x128xf32, #tpu.memory_space<vmem>>, vector<128x128xf32>,
    %cst_53 = arith.constant dense<0.000000e+00> : vector<64x128xf32>
    %75 = tpu.matmul %0, %73, %cst_53 {dimension_numbers = #tpu.dot_dimension_numbers<[1], [0], [0], [1], [0, 0, 1, 1], [], []>} : vector<64x128xf32>, vector<128x128xf32>, vector<64x128xf32> -> vector<64x128xf32>
    %c0_54 = arith.constant 0 : index
    %c0_55 = arith.constant 0 : index
    %76 = vector.load %arg3[%c0_54, %c0_55] : memref<64x64xf32, #tpu.memory_space<vmem>>, vector<64x64xf32>
    %cst_56 = arith.constant dense<0.000000e+00> : vector<64x128xf32>
    %77 = tpu.matmul %76, %75, %cst_56 {dimension_numbers = #tpu.dot_dimension_numbers<[1], [0], [0], [1], [0, 0, 1, 1], [], []>} : vector<64x64xf32>, vector<64x128xf32>, vector<64x128xf32> -> vector<64x128xf32>
    %c0_57 = arith.constant 0 : index
    %c0_58 = arith.constant 0 : index
    %78 = vector.load %arg10[%c0_57, %c0_58] : memref<64x128xf32, #tpu.memory_space<vmem>>, vector<64x128xf32>
    tpu.vector_store %arg10[%c0_57, %c0_58], %77 {strides = array<i32>} : memref<64x128xf32, #tpu.memory_space<vmem>>, vector<64x128xf32>,
    return
  }
}

</mosaic_0001>

<bundles_post_ra>
// kernel: tpu_custom_call.1
= control target key start
LH: loop header
LB: loop body
LE: loop exit
PB: predicated region body
PF: predicated region fallthrough
CT: control target
= control target key end

     0   :  { %16 = vsyncpa [#allocation3], 0  ;;  %s4418_s0 = inlined_call_operand.vmem [shape: s32[128,1], index: 0, kind: input, shape index: {}]   ;;  %s4419_s1 = inlined_call_operand.vmem [shape: f32[128,1], index: 1, kind: input, shape index: {}]   ;;  %s4420_s2 = inlined_call_operand.vmem [shape: f32[64,128], index: 2, kind: input, shape index: {}]   ;;  %s4421_s3 = inlined_call_operand.vmem [shape: f32[64,64], index: 3, kind: input, shape index: {}]   ;;  %s4422_s4 = inlined_call_operand.hbm [shape: f32[128,128], index: 4, kind: input, shape index: {}, may-alias: {4,9}]   ;;  %s4423_s5 = inlined_call_operand.vmem [shape: f32[3,128,128], index: 5, kind: input, shape index: {}]   ;;  %s4424_s6 = inlined_call_operand.hbm [shape: f32[3,128,128], index: 6, kind: input, shape index: {}]   ;;  %s4425_s7 = inlined_call_operand.vmem [shape: f32[3,1,128], index: 7, kind: input, shape index: {}]   ;;  %s4426_s8 = inlined_call_operand.vmem [shape: f32[3,1,128], index: 8, kind: input, shape index: {}]   ;;  %s4427_s9 = inlined_call_operand.hbm [shape: f32[128,128], index: 9, kind: output, shape index: {0}, may-alias: {4,9}]   ;;  %s4428_s10 = inlined_call_operand.hbm [shape: f32[64,128], index: 10, kind: output, shape index: {1}]  }
   0x1   :  { %17 = vsyncpa [#allocation6], 0 }
   0x2   :  { %18 = vsyncpa [#allocation4], 0 }
   0x3   :  { %19 = vsyncpa [#allocation9], 0  ;;  %s3572_s13 = smov [#allocation2]   ;;  %s3476_s17 = scalar_lea.hbm %s4422_s4, 2048 }
   0x4   :  { %s33_s14 = sshll.u32 %s3572_s13, 4  ;;  %p3477_p0 = scmp.ne.s32.totalorder %s4422_s4, %s3476_s17  ;;  %s34_s14 = int_to_ptr.vmem [resolvable:$true] %s33_s14 }
   0x5   :  { %p3480_p1 = scmp.lt.u32.totalorder %s3476_s17, %s4422_s4 }
   0x7   :  { %p3482_p2 = pnand %p3480_p1, %p3477_p0 }
   0x9   :  { %3485 = shalt.err (!%p3482_p2)
}
   0xa   :  { %s3486_s22 = scalar_lea.vmem %s34_s14, 2048  ;;  %p3491_p4 = scmp.lt.s32.totalorder %s34_s14, %s34_s14 }
   0xb   :  { %p3487_p3 = scmp.ne.s32.totalorder %s34_s14, %s3486_s22  ;;  %p3492_p5 = scmp.lt.s32.totalorder %s3486_s22, %s3486_s22 }
   0xd   :  { %p3493_p6 = por %p3492_p5, %p3491_p4 }
   0xf   :  { %p3494_p7 = pnand %p3493_p6, %p3487_p3 }
  0x11   :  { %3497 = shalt.err (!%p3494_p7)
}
  0x12   :  { %s3573_s23 = smov 128   ;;  %s3574_s24 = smov 8  }
  0x13   :  { %39 = dma.hbm_to_vmem [thread:$0]  %s4422_s4, 2048, %s34_s14, [#allocation3], %s3573_s23, %s3573_s23, %s3574_s24  }
  0x14   :  { %s3575_s27 = smov [#allocation5]   ;;  %s3498_s11 = scalar_lea.hbm %s4424_s6, 6144 }
  0x15   :  { %s47_s28 = sshll.u32 %s3575_s27, 4  ;;  %p3499_p8 = scmp.ne.s32.totalorder %s4424_s6, %s3498_s11  ;;  %s48_s28 = int_to_ptr.vmem [resolvable:$true] %s47_s28 }
  0x16   :  { %p3502_p9 = scmp.lt.u32.totalorder %s3498_s11, %s4424_s6 }
  0x18   :  { %p3504_p10 = pnand %p3502_p9, %p3499_p8 }
  0x1a   :  { %3507 = shalt.err (!%p3504_p10)
}
  0x1b   :  { %s3508_s17 = scalar_lea.vmem %s48_s28, 6144  ;;  %p3513_p12 = scmp.lt.s32.totalorder %s48_s28, %s48_s28 }
  0x1c   :  { %p3509_p11 = scmp.ne.s32.totalorder %s48_s28, %s3508_s17  ;;  %p3514_p13 = scmp.lt.s32.totalorder %s3508_s17, %s3508_s17 }
  0x1e   :  { %p3515_p0 = por %p3514_p13, %p3513_p12 }
  0x20   :  { %p3516_p1 = pnand %p3515_p0, %p3509_p11 }
  0x22   :  { %3519 = shalt.err (!%p3516_p1)
}
  0x23   :  { %53 = dma.hbm_to_vmem [thread:$0]  %s4424_s6, 6144, %s48_s28, [#allocation6], %s3573_s23, %s3573_s23, %s3574_s24  }
  0x24   :  { %3564 = dma.done.wait [#allocation3], 2048  }
  0x25   :  { %3565 = vsyncadd [#allocation3], 4294965248 }
  0x26   :  { %3566 = dma.done.wait [#allocation6], 6144  }
  0x27   :  { %3567 = vsyncadd [#allocation6], 4294961152  ;;  %v3576_v0 = vmov 0   ;;  %v170_v1 = vld [vmem:[%s4419_s1] sm:$0xff]  ;;  %v171_v3 = vld [vmem:[%s4419_s1 + $0x8] sm:$0xff]  ;;  %vm282_vm0 = vcmask 523264  }
  0x28   :  { %3298 = vset.pattern.permute.xlu1 %v3576_v0  ;;  %3297 = vset.pattern.permute.xlu0 %v3576_v0  ;;  %v90_v2 = vld [vmem:[%s4418_s0] sm:$0xff]  ;;  %v91_v4 = vld [vmem:[%s4418_s0 + $0x8] sm:$0xff]  ;;  %v93_v5 = vld [vmem:[%s4418_s0 + $0x18] sm:$0xff]  ;;  %s3577_s19 = smov [#allocation7]  }
  0x29   :  { %188 = vperm.xlu1 %3298, %v170_v1   ;;  %107 = vperm.xlu0 %3297, %v90_v2   ;;  %v92_v6 = vld [vmem:[%s4418_s0 + $0x10] sm:$0xff]  ;;  %v173_v7 = vld [vmem:[%s4419_s1 + $0x18] sm:$0xff]  ;;  %v64_v9 = vld [vmem:[%s4420_s2] sm:$0xff]  ;;  %s2099_s20 = sshll.u32 %s3577_s19, 4  ;;  %s2100_s20 = int_to_ptr.vmem [resolvable:$true] %s2099_s20 }
  0x2a   :  { %v172_v8 = vld [vmem:[%s4419_s1 + $0x10] sm:$0xff]  ;;  %v65_v10 = vld [vmem:[%s4420_s2 + $0x8] sm:$0xff]  ;;  %v67_v12 = vld [vmem:[%s4420_s2 + $0x18] sm:$0xff]  ;;  %s3520_s21 = scalar_lea.vmem %s2100_s20, 2048  ;;  %p3525_p3 = scmp.lt.s32.totalorder %s2100_s20, %s2100_s20 }
  0x2b   :  { %v66_v11 = vld [vmem:[%s4420_s2 + $0x10] sm:$0xff]  ;;  %v2930_v13 = vpack.c.bf16 %v65_v10, %v64_v9  ;;  %v68_v15 = vld [vmem:[%s4420_s2 + $0x20] sm:$0xff]  ;;  %v69_v16 = vld [vmem:[%s4420_s2 + $0x28] sm:$0xff]  ;;  %p3521_p2 = scmp.ne.s32.totalorder %s2100_s20, %s3520_s21  ;;  %p3526_p4 = scmp.lt.s32.totalorder %s3520_s21, %s3520_s21 }
  0x2c   :  { %v2934_v14 = vpack.c.bf16 %v67_v12, %v66_v11  ;;  %v95_v17 = vld [vmem:[%s4418_s0 + $0x28] sm:$0xff]  ;;  %v94_v18 = vld [vmem:[%s4418_s0 + $0x20] sm:$0xff]  ;;  %v2938_v19 = vpack.c.bf16 %v69_v16, %v68_v15  ;;  %v70_v20 = vld [vmem:[%s4420_s2 + $0x30] sm:$0xff] }
  0x2d   :  { %193 = vperm.xlu1 %3298, %v171_v3   ;;  %110 = vperm.xlu0 %3297, %v91_v4   ;;  %v71_v21 = vld [vmem:[%s4420_s2 + $0x38] sm:$0xff]  ;;  %v175_v22 = vld [vmem:[%s4419_s1 + $0x28] sm:$0xff]  ;;  %v174_v23 = vld [vmem:[%s4419_s1 + $0x20] sm:$0xff]  ;;  %p3527_p5 = por %p3526_p4, %p3525_p3 }
  0x2e   :  { %2931 = vmatprep.subr.bf16.mxu0 %v2930_v13  ;;  %v2942_v24 = vpack.c.bf16 %v71_v21, %v70_v20  ;;  %v97_v25 = vld [vmem:[%s4418_s0 + $0x38] sm:$0xff]  ;;  %v96_v26 = vld [vmem:[%s4418_s0 + $0x30] sm:$0xff]  ;;  %v99_v29 = vld [vmem:[%s4418_s0 + $0x48] sm:$0xff] }
  0x2f   :  { %2933 = vmatpush3.bf16.msra.mxu0 %v2930_v13  ;;  %v177_v27 = vld [vmem:[%s4419_s1 + $0x38] sm:$0xff]  ;;  %v176_v28 = vld [vmem:[%s4419_s1 + $0x30] sm:$0xff]  ;;  %v98_v30 = vld [vmem:[%s4418_s0 + $0x40] sm:$0xff]  ;;  %p3528_p6 = pnand %p3527_p5, %p3521_p2 }
  0x30   :  { %2935 = vmatprep.subr.bf16.mxu0 %v2934_v14  ;;  %v179_v31 = vld [vmem:[%s4419_s1 + $0x48] sm:$0xff]  ;;  %v178_v32 = vld [vmem:[%s4419_s1 + $0x40] sm:$0xff]  ;;  %v101_v33 = vld [vmem:[%s4418_s0 + $0x58] sm:$0xff] }
  0x31   :  { %116 = vperm.xlu1 %3298, %v93_v5   ;;  %113 = vperm.xlu0 %3297, %v92_v6   ;;  %v100_v34 = vld [vmem:[%s4418_s0 + $0x50] sm:$0xff]  ;;  %v181_v35 = vld [vmem:[%s4419_s1 + $0x58] sm:$0xff]  ;;  %v103_v37 = vld [vmem:[%s4418_s0 + $0x68] sm:$0xff] }
  0x32   :  { %v180_v36 = vld [vmem:[%s4419_s1 + $0x50] sm:$0xff]  ;;  %v102_v38 = vld [vmem:[%s4418_s0 + $0x60] sm:$0xff]  ;;  %v183_v39 = vld [vmem:[%s4419_s1 + $0x68] sm:$0xff] }
  0x33   :  { %2937 = vmatpush3.bf16.msra.mxu0 %v2934_v14  ;;  %v182_v40 = vld [vmem:[%s4419_s1 + $0x60] sm:$0xff]  ;;  %v105_v41 = vld [vmem:[%s4418_s0 + $0x78] sm:$0xff]  ;;  %v104_v42 = vld [vmem:[%s4418_s0 + $0x70] sm:$0xff] }
  0x34   :  { %2939 = vmatprep.subr.bf16.mxu0 %v2938_v19  ;;  %v185_v43 = vld [vmem:[%s4419_s1 + $0x78] sm:$0xff]  ;;  %v184_v44 = vld [vmem:[%s4419_s1 + $0x70] sm:$0xff]  ;;  %v476_v45 = vld [vmem:[%s4423_s5] sm:$0xff] }
  0x35   :  { %203 = vperm.xlu1 %3298, %v173_v7   ;;  %198 = vperm.xlu0 %3297, %v172_v8   ;;  %v477_v46 = vld [vmem:[%s4423_s5 + $0x8] sm:$0xff]  ;;  %v2146_v47 = vld [vmem:[%s4423_s5 + $0x80] sm:$0xff]  ;;  %v478_v50 = vld [vmem:[%s4423_s5 + $0x10] sm:$0xff]  ;;  %v88_v8 = vlaneseq }
  0x36   :  { %v2946_v48 = vpack.c.bf16 %v477_v46, %v476_v45  ;;  %v2147_v49 = vld [vmem:[%s4423_s5 + $0x88] sm:$0xff]  ;;  %v479_v51 = vld [vmem:[%s4423_s5 + $0x18] sm:$0xff]  ;;  %v480_v54 = vld [vmem:[%s4423_s5 + $0x20] sm:$0xff] }
  0x37   :  { %2941 = vmatpush3.bf16.msra.mxu0 %v2938_v19  ;;  %v3010_v52 = vpack.c.bf16 %v2147_v49, %v2146_v47  ;;  %v2950_v53 = vpack.c.bf16 %v479_v51, %v478_v50  ;;  %v481_v55 = vld [vmem:[%s4423_s5 + $0x28] sm:$0xff]  ;;  %v482_v57 = vld [vmem:[%s4423_s5 + $0x30] sm:$0xff]  ;;  %v483_v58 = vld [vmem:[%s4423_s5 + $0x38] sm:$0xff]  ;;  %v3838_v9 = vand.u32 127, %v88_v8 }
  0x38   :  { %2943 = vmatprep.subr.bf16.mxu0 %v2942_v24  ;;  %2947 = vmatprep.subr.bf16.mxu1 %v2946_v48  ;;  %v2954_v56 = vpack.c.bf16 %v481_v55, %v480_v54  ;;  %v2958_v59 = vpack.c.bf16 %v483_v58, %v482_v57  ;;  %v484_v60 = vld [vmem:[%s4423_s5 + $0x40] sm:$0xff]  ;;  %v485_v61 = vld [vmem:[%s4423_s5 + $0x48] sm:$0xff]  ;;  %v486_v63 = vld [vmem:[%s4423_s5 + $0x50] sm:$0xff] }
  0x39   :  { %122 = vperm.xlu1 %3298, %v95_v17   ;;  %119 = vperm.xlu0 %3297, %v94_v18   ;;  %v2962_v62 = vpack.c.bf16 %v485_v61, %v484_v60  ;;  %v487_v0 = vld [vmem:[%s4423_s5 + $0x58] sm:$0xff]  ;;  %v488_v2 = vld [vmem:[%s4423_s5 + $0x60] sm:$0xff]  ;;  %v489_v3 = vld [vmem:[%s4423_s5 + $0x68] sm:$0xff] }
  0x3a   :  { %2949 = vmatpush3.bf16.msra.mxu1 %v2946_v48  ;;  %v2966_v1 = vpack.c.bf16 %v487_v0, %v486_v63  ;;  %v2970_v4 = vpack.c.bf16 %v489_v3, %v488_v2  ;;  %v490_v5 = vld [vmem:[%s4423_s5 + $0x70] sm:$0xff]  ;;  %v491_v6 = vld [vmem:[%s4423_s5 + $0x78] sm:$0xff]  ;;  %v2150_v19 = vld [vmem:[%s4423_s5 + $0xa0] sm:$0xff] }
  0x3b   :  { %2945 = vmatpush3.bf16.msra.mxu0 %v2942_v24  ;;  %2951 = vmatprep.subr.bf16.mxu1 %v2950_v53  ;;  %v2974_v7 = vpack.c.bf16 %v491_v6, %v490_v5  ;;  %v2148_v13 = vld [vmem:[%s4423_s5 + $0x90] sm:$0xff]  ;;  %v2149_v14 = vld [vmem:[%s4423_s5 + $0x98] sm:$0xff]  ;;  %v2151_v20 = vld [vmem:[%s4423_s5 + $0xa8] sm:$0xff] }
  0x3c   :  { %3011 = vmatprep.subr.bf16.mxu0 %v3010_v52  ;;  %v3014_v17 = vpack.c.bf16 %v2149_v14, %v2148_v13  ;;  %v2152_v24 = vld [vmem:[%s4423_s5 + $0xb0] sm:$0xff]  ;;  %v2161_v49 = vld [vmem:[%s4423_s5 + $0xf8] sm:$0xff] }
  0x3d   :  { %213 = vperm.xlu1 %3298, %v175_v22   ;;  %208 = vperm.xlu0 %3297, %v174_v23   ;;  %v3018_v23 = vpack.c.bf16 %v2151_v20, %v2150_v19  ;;  %v2160_v48 = vld [vmem:[%s4423_s5 + $0xf0] sm:$0xff]  ;;  %v984_v20 = vld [vmem:[#allocation5 + $0x88] sm:$0xff] }
  0x3e   :  { %2953 = vmatpush3.bf16.msra.mxu1 %v2950_v53  ;;  %v3038_v54 = vpack.c.bf16 %v2161_v49, %v2160_v48  ;;  %v654_v49 = vld [vmem:[#allocation5 + $0x50] sm:$0xff] }
  0x3f   :  { %2955 = vmatprep.subr.bf16.mxu1 %v2954_v56 }
  0x41   :  { %128 = vperm.xlu1 %3298, %v97_v25   ;;  %125 = vperm.xlu0 %3297, %v96_v26   ;;  %v2153_v25 = vld [vmem:[%s4423_s5 + $0xb8] sm:$0xff] }
  0x42   :  { %2957 = vmatpush3.bf16.msra.mxu1 %v2954_v56 }
  0x43   :  { %2959 = vmatprep.subr.bf16.mxu1 %v2958_v59 }
  0x45   :  { %223 = vperm.xlu1 %3298, %v177_v27   ;;  %218 = vperm.xlu0 %3297, %v176_v28  }
  0x46   :  { %2961 = vmatpush3.bf16.msra.mxu1 %v2958_v59 }
  0x47   :  { %2963 = vmatprep.subr.bf16.mxu1 %v2962_v62 }
  0x49   :  { %134 = vperm.xlu1 %3298, %v99_v29   ;;  %131 = vperm.xlu0 %3297, %v98_v30   ;;  %v3022_v30 = vpack.c.bf16 %v2153_v25, %v2152_v24  ;;  %v985_v24 = vld [vmem:[#allocation5 + $0x90] sm:$0xff] }
  0x4a   :  { %2965 = vmatpush3.bf16.msra.mxu1 %v2962_v62 }
  0x4b   :  { %2967 = vmatprep.subr.bf16.mxu1 %v2966_v1 }
  0x4d   :  { %233 = vperm.xlu1 %3298, %v179_v31   ;;  %228 = vperm.xlu0 %3297, %v178_v32   ;;  %v2154_v31 = vld [vmem:[%s4423_s5 + $0xc0] sm:$0xff]  ;;  %v2155_v32 = vld [vmem:[%s4423_s5 + $0xc8] sm:$0xff] }
  0x4e   :  { %2969 = vmatpush3.bf16.msra.mxu1 %v2966_v1 }
  0x4f   :  { %2971 = vmatprep.subr.bf16.mxu1 %v2970_v4 }
  0x51   :  { %140 = vperm.xlu1 %3298, %v101_v33   ;;  %137 = vperm.xlu0 %3297, %v100_v34  }
  0x52   :  { %2973 = vmatpush3.bf16.msra.mxu1 %v2970_v4 }
  0x53   :  { %2975 = vmatprep.subr.bf16.mxu1 %v2974_v7 }
  0x55   :  { %243 = vperm.xlu1 %3298, %v181_v35   ;;  %238 = vperm.xlu0 %3297, %v180_v36   ;;  %v3026_v35 = vpack.c.bf16 %v2155_v32, %v2154_v31  ;;  %v2156_v36 = vld [vmem:[%s4423_s5 + $0xd0] sm:$0xff]  ;;  %v987_v31 = vld [vmem:[#allocation5 + $0xa0] sm:$0xff]  ;;  %v988_v32 = vld [vmem:[#allocation5 + $0xa8] sm:$0xff] }
  0x56   :  { %2977 = vmatpush3.bf16.msra.mxu1 %v2974_v7 }
  0x59   :  { %146 = vperm.xlu1 %3298, %v103_v37   ;;  %143 = vperm.xlu0 %3297, %v102_v38   ;;  %v2157_v37 = vld [vmem:[%s4423_s5 + $0xd8] sm:$0xff] }
  0x5d   :  { %253 = vperm.xlu1 %3298, %v183_v39   ;;  %248 = vperm.xlu0 %3297, %v182_v40  }
  0x61   :  { %152 = vperm.xlu1 %3298, %v105_v41   ;;  %149 = vperm.xlu0 %3297, %v104_v42   ;;  %v3030_v42 = vpack.c.bf16 %v2157_v37, %v2156_v36  ;;  %v651_v36 = vld [vmem:[#allocation5 + $0x38] sm:$0xff]  ;;  %v989_v37 = vld [vmem:[#allocation5 + $0xb0] sm:$0xff] }
  0x65   :  { %263 = vperm.xlu1 %3298, %v185_v43   ;;  %258 = vperm.xlu0 %3297, %v184_v44   ;;  %v2158_v43 = vld [vmem:[%s4423_s5 + $0xe0] sm:$0xff]  ;;  %v2159_v44 = vld [vmem:[%s4423_s5 + $0xe8] sm:$0xff] }
  0x66   :  { %v3034_v47 = vpack.c.bf16 %v2159_v44, %v2158_v43  ;;  %v652_v43 = vld [vmem:[#allocation5 + $0x40] sm:$0xff]  ;;  %v653_v44 = vld [vmem:[#allocation5 + $0x48] sm:$0xff] }
  0xa8   :  { %v189_v10 = vpop.permute.xlu1 %188  ;;  %v108_v11 = vpop.permute.xlu0 %107 }
  0xa9   :  { %vm154_vm1 = vcmp.eq.s32.totalorder %v3838_v9, %v108_v11 }
  0xaa   :  { %v266_v12 = vsel %vm154_vm1, %v189_v10, 0.0 }
  0xab   :  { %2498 = vmatprep.mubr.msk.f32.mxu0 %vm282_vm0, %v266_v12 }
  0xac   :  { %v194_v15 = vpop.permute.xlu1 %193  ;;  %v111_v16 = vpop.permute.xlu0 %110 }
  0xad   :  { %vm155_vm2 = vcmp.eq.s32.totalorder %v3838_v9, %v111_v16  ;;  %v644_v16 = vld [vmem:[#allocation5] sm:$0xff] }
  0xae   :  { %v267_v18 = vsel %vm155_vm2, %v194_v15, 0.0 }
  0xaf   :  { %2499 = vmatmul.mubr.msk.f32.vlgmr.msra.gmra.mrb[0].mxu0 %vm282_vm0, %v267_v18  ;;  %v983_v18 = vld [vmem:[#allocation5 + $0x80] sm:$0xff] }
  0xb0   :  { %v117_v21 = vpop.permute.xlu1 %116  ;;  %v114_v22 = vpop.permute.xlu0 %113  ;;  %3013 = vmatpush3.bf16.msra.mxu0 %v3010_v52 }
  0xb1   :  { %3015 = vmatprep.subr.bf16.mxu0 %v3014_v17  ;;  %vm157_vm3 = vcmp.eq.s32.totalorder %v3838_v9, %v117_v21  ;;  %vm156_vm4 = vcmp.eq.s32.totalorder %v3838_v9, %v114_v22  ;;  %v3042_v21 = vpack.c.bf16 %v984_v20, %v983_v18  ;;  %v646_v22 = vld [vmem:[#allocation5 + $0x10] sm:$0xff] }
  0xb4   :  { %v204_v26 = vpop.permute.xlu1 %203  ;;  %v199_v27 = vpop.permute.xlu0 %198  ;;  %3017 = vmatpush3.bf16.msra.mxu0 %v3014_v17  ;;  %v645_v17 = vld [vmem:[#allocation5 + $0x8] sm:$0xff] }
  0xb5   :  { %v269_v28 = vsel %vm157_vm3, %v204_v26, 0.0  ;;  %v268_v29 = vsel %vm156_vm4, %v199_v27, 0.0  ;;  %3019 = vmatprep.subr.bf16.mxu0 %v3018_v23  ;;  %v2978_v19 = vpack.c.bf16 %v645_v17, %v644_v16 }
  0xb6   :  { %2501 = vmatprep.mubr.msk.f32.mxu0 %vm282_vm0, %v268_v29  ;;  %v648_v29 = vld [vmem:[#allocation5 + $0x20] sm:$0xff] }
  0xb7   :  { %2502 = vmatmul.mubr.msk.f32.gmra.mrb[2].mxu0 %vm282_vm0, %v269_v28  ;;  %2979 = vmatprep.subr.bf16.mxu1 %v2978_v19 }
  0xb8   :  { %v123_v33 = vpop.permute.xlu1 %122  ;;  %v120_v34 = vpop.permute.xlu0 %119  ;;  %3021 = vmatpush3.bf16.msra.mxu0 %v3018_v23  ;;  %v647_v23 = vld [vmem:[#allocation5 + $0x18] sm:$0xff] }
  0xb9   :  { %3023 = vmatprep.subr.bf16.mxu0 %v3022_v30  ;;  %vm159_vm5 = vcmp.eq.s32.totalorder %v3838_v9, %v123_v33  ;;  %vm158_vm6 = vcmp.eq.s32.totalorder %v3838_v9, %v120_v34  ;;  %v2982_v27 = vpack.c.bf16 %v647_v23, %v646_v22  ;;  %v3050_v34 = vpack.c.bf16 %v988_v32, %v987_v31  ;;  %v3980_v22 = vld [vmem:[#allocation2] sm:$0xff]  ;;  %v2168_v23 = vld [vmem:[%s4423_s5 + $0x110] sm:$0xff] }
  0xba   :  { %v2170_v32 = vld [vmem:[%s4423_s5 + $0x120] sm:$0xff] }
  0xbc   :  { %v214_v38 = vpop.permute.xlu1 %213  ;;  %v209_v39 = vpop.permute.xlu0 %208  ;;  %3025 = vmatpush3.bf16.msra.mxu0 %v3022_v30  ;;  %v649_v30 = vld [vmem:[#allocation5 + $0x28] sm:$0xff] }
  0xbd   :  { %v271_v40 = vsel %vm159_vm5, %v214_v38, 0.0  ;;  %v270_v41 = vsel %vm158_vm6, %v209_v39, 0.0  ;;  %3027 = vmatprep.subr.bf16.mxu0 %v3026_v35  ;;  %v2986_v33 = vpack.c.bf16 %v649_v30, %v648_v29  ;;  %v990_v38 = vld [vmem:[#allocation5 + $0xb8] sm:$0xff]  ;;  %v3996_v29 = vld [vmem:[#allocation2 + $0x10] sm:$0xff] }
  0xbe   :  { %2504 = vmatprep.mubr.msk.f32.mxu0 %vm282_vm0, %v270_v41 }
  0xbf   :  { %2505 = vmatmul.mubr.msk.f32.gmra.mrb[4].mxu0 %vm282_vm0, %v271_v40 }
  0xc0   :  { %v129_v45 = vpop.permute.xlu1 %128  ;;  %v126_v46 = vpop.permute.xlu0 %125  ;;  %3029 = vmatpush3.bf16.msra.mxu0 %v3026_v35  ;;  %v650_v35 = vld [vmem:[#allocation5 + $0x30] sm:$0xff] }
  0xc1   :  { %3031 = vmatprep.subr.bf16.mxu0 %v3030_v42  ;;  %vm161_vm7 = vcmp.eq.s32.totalorder %v3838_v9, %v129_v45  ;;  %vm160_vm8 = vcmp.eq.s32.totalorder %v3838_v9, %v126_v46  ;;  %v2990_v41 = vpack.c.bf16 %v651_v36, %v650_v35  ;;  %v991_v45 = vld [vmem:[#allocation5 + $0xc0] sm:$0xff]  ;;  %v992_v46 = vld [vmem:[#allocation5 + $0xc8] sm:$0xff]  ;;  %v4006_v36 = vld [vmem:[#allocation2 + $0x18] sm:$0xff] }
  0xc2   :  { %v3058_v48 = vpack.c.bf16 %v992_v46, %v991_v45  ;;  %v1328_v35 = vld [vmem:[#allocation5 + $0x128] sm:$0xff]  ;;  %v1330_v45 = vld [vmem:[#allocation5 + $0x138] sm:$0xff] }
  0xc3   :  { %v4020_v46 = vld [vmem:[#allocation2 + $0x28] sm:$0xff] }
  0xc4   :  { %v224_v50 = vpop.permute.xlu1 %223  ;;  %v219_v51 = vpop.permute.xlu0 %218  ;;  %3033 = vmatpush3.bf16.msra.mxu0 %v3030_v42  ;;  %v3054_v42 = vpack.c.bf16 %v990_v38, %v989_v37  ;;  %v4010_v37 = vld [vmem:[#allocation2 + $0x20] sm:$0xff] }
  0xc5   :  { %v273_v52 = vsel %vm161_vm7, %v224_v50, 0.0  ;;  %v272_v53 = vsel %vm160_vm8, %v219_v51, 0.0  ;;  %3035 = vmatprep.subr.bf16.mxu0 %v3034_v47  ;;  %v655_v50 = vld [vmem:[#allocation5 + $0x58] sm:$0xff]  ;;  %v993_v51 = vld [vmem:[#allocation5 + $0xd0] sm:$0xff] }
  0xc6   :  { %2507 = vmatprep.mubr.msk.f32.mxu0 %vm282_vm0, %v272_v53 }
  0xc7   :  { %2508 = vmatmul.mubr.msk.f32.gmra.mrb[6].mxu0 %vm282_vm0, %v273_v52  ;;  %v994_v52 = vld [vmem:[#allocation5 + $0xd8] sm:$0xff] }
  0xc8   :  { %v135_v55 = vpop.permute.xlu1 %134  ;;  %v132_v56 = vpop.permute.xlu0 %131  ;;  %3037 = vmatpush3.bf16.msra.mxu0 %v3034_v47  ;;  %v2994_v47 = vpack.c.bf16 %v653_v44, %v652_v43  ;;  %v2173_v43 = vld [vmem:[%s4423_s5 + $0x138] sm:$0xff]  ;;  %v1329_v44 = vld [vmem:[#allocation5 + $0x130] sm:$0xff] }
  0xc9   :  { %3039 = vmatprep.subr.bf16.mxu0 %v3038_v54  ;;  %vm163_vm9 = vcmp.eq.s32.totalorder %v3838_v9, %v135_v55  ;;  %vm162_vm10 = vcmp.eq.s32.totalorder %v3838_v9, %v132_v56  ;;  %v2998_v55 = vpack.c.bf16 %v655_v50, %v654_v49  ;;  %v3062_v56 = vpack.c.bf16 %v994_v52, %v993_v51  ;;  %v2174_v50 = vld [vmem:[%s4423_s5 + $0x140] sm:$0xff]  ;;  %v2175_v51 = vld [vmem:[%s4423_s5 + $0x148] sm:$0xff] }
  0xca   :  { %v3118_v49 = vpack.c.bf16 %v1330_v45, %v1329_v44  ;;  %v1331_v52 = vld [vmem:[#allocation5 + $0x140] sm:$0xff] }
  0xcc   :  { %v234_v57 = vpop.permute.xlu1 %233  ;;  %v229_v58 = vpop.permute.xlu0 %228  ;;  %3041 = vmatpush3.bf16.msra.mxu0 %v3038_v54 }
  0xcd   :  { %v275_v59 = vsel %vm163_vm9, %v234_v57, 0.0  ;;  %v274_v60 = vsel %vm162_vm10, %v229_v58, 0.0  ;;  %3043 = vmatprep.subr.bf16.mxu0 %v3042_v21  ;;  %v656_v57 = vld [vmem:[#allocation5 + $0x60] sm:$0xff]  ;;  %v657_v58 = vld [vmem:[#allocation5 + $0x68] sm:$0xff] }
  0xce   :  { %2510 = vmatprep.mubr.msk.f32.mxu0 %vm282_vm0, %v274_v60  ;;  %v996_v60 = vld [vmem:[#allocation5 + $0xe8] sm:$0xff] }
  0xcf   :  { %2511 = vmatmul.mubr.msk.f32.gmra.mrb[8].mxu0 %vm282_vm0, %v275_v59  ;;  %v995_v59 = vld [vmem:[#allocation5 + $0xe0] sm:$0xff] }
  0xd0   :  { %v141_v61 = vpop.permute.xlu1 %140  ;;  %v138_v62 = vpop.permute.xlu0 %137 }
  0xd1   :  { %vm165_vm11 = vcmp.eq.s32.totalorder %v3838_v9, %v141_v61  ;;  %vm164_vm12 = vcmp.eq.s32.totalorder %v3838_v9, %v138_v62  ;;  %v3002_v61 = vpack.c.bf16 %v657_v58, %v656_v57  ;;  %v3066_v62 = vpack.c.bf16 %v996_v60, %v995_v59  ;;  %v4038_v57 = vld [vmem:[#allocation2 + $0x40] sm:$0xff]  ;;  %v2176_v60 = vld [vmem:[%s4423_s5 + $0x150] sm:$0xff] }
  0xd2   :  { %v3090_v58 = vpack.c.bf16 %v2175_v51, %v2174_v50 }
  0xd4   :  { %v244_v63 = vpop.permute.xlu1 %243  ;;  %v239_v0 = vpop.permute.xlu0 %238 }
  0xd5   :  { %v277_v1 = vsel %vm165_vm11, %v244_v63, 0.0  ;;  %v276_v2 = vsel %vm164_vm12, %v239_v0, 0.0  ;;  %v658_v63 = vld [vmem:[#allocation5 + $0x70] sm:$0xff]  ;;  %v659_v0 = vld [vmem:[#allocation5 + $0x78] sm:$0xff] }
  0xd6   :  { %2513 = vmatprep.mubr.msk.f32.mxu0 %vm282_vm0, %v276_v2  ;;  %v998_v2 = vld [vmem:[#allocation5 + $0xf8] sm:$0xff] }
  0xd7   :  { %2514 = vmatmul.mubr.msk.f32.gmra.mrb[10].mxu0 %vm282_vm0, %v277_v1  ;;  %v997_v1 = vld [vmem:[#allocation5 + $0xf0] sm:$0xff] }
  0xd8   :  { %v147_v3 = vpop.permute.xlu1 %146  ;;  %v144_v4 = vpop.permute.xlu0 %143 }
  0xd9   :  { %vm167_vm13 = vcmp.eq.s32.totalorder %v3838_v9, %v147_v3  ;;  %vm166_vm14 = vcmp.eq.s32.totalorder %v3838_v9, %v144_v4 }
  0xdc   :  { %v254_v5 = vpop.permute.xlu1 %253  ;;  %v249_v6 = vpop.permute.xlu0 %248 }
  0xdd   :  { %v279_v7 = vsel %vm167_vm13, %v254_v5, 0.0  ;;  %v278_v8 = vsel %vm166_vm14, %v249_v6, 0.0  ;;  %v3006_v5 = vpack.c.bf16 %v659_v0, %v658_v63  ;;  %v3070_v6 = vpack.c.bf16 %v998_v2, %v997_v1  ;;  %v1334_v63 = vld [vmem:[#allocation5 + $0x158] sm:$0xff]  ;;  %v4048_v0 = vld [vmem:[#allocation2 + $0x48] sm:$0xff]  ;;  %v4052_v1 = vld [vmem:[#allocation2 + $0x50] sm:$0xff] }
  0xde   :  { %2516 = vmatprep.mubr.msk.f32.mxu0 %vm282_vm0, %v278_v8  ;;  %v2167_v8 = vld [vmem:[%s4423_s5 + $0x108] sm:$0xff] }
  0xdf   :  { %2517 = vmatmul.mubr.msk.f32.gmra.mrb[12].mxu0 %vm282_vm0, %v279_v7  ;;  %v2166_v7 = vld [vmem:[%s4423_s5 + $0x100] sm:$0xff] }
  0xe0   :  { %v153_v10 = vpop.permute.xlu1 %152  ;;  %v150_v11 = vpop.permute.xlu0 %149 }
  0xe1   :  { %vm169_vm15 = vcmp.eq.s32.totalorder %v3838_v9, %v153_v10  ;;  %vm168_vm1 = vcmp.eq.s32.totalorder %v3838_v9, %v150_v11  ;;  %v986_v9 = vld [vmem:[#allocation5 + $0x98] sm:$0xff]  ;;  %v1323_v10 = vld [vmem:[#allocation5 + $0x100] sm:$0xff]  ;;  %v1324_v11 = vld [vmem:[#allocation5 + $0x108] sm:$0xff] }
  0xe2   :  { %v3046_v28 = vpack.c.bf16 %v986_v9, %v985_v24  ;;  %v2169_v24 = vld [vmem:[%s4423_s5 + $0x118] sm:$0xff]  ;;  %v1325_v9 = vld [vmem:[#allocation5 + $0x110] sm:$0xff] }
  0xe3   :  { %v3078_v30 = vpack.c.bf16 %v2169_v24, %v2168_v23  ;;  %v2180_v24 = vld [vmem:[%s4423_s5 + $0x170] sm:$0xff] }
  0xe4   :  { %v264_v12 = vpop.permute.xlu1 %263  ;;  %v259_v13 = vpop.permute.xlu0 %258 }
  0xe5   :  { %v281_v14 = vsel %vm169_vm15, %v264_v12, 0.0  ;;  %v280_v15 = vsel %vm168_vm1, %v259_v13, 0.0  ;;  %v3074_v12 = vpack.c.bf16 %v2167_v8, %v2166_v7  ;;  %v3106_v13 = vpack.c.bf16 %v1324_v11, %v1323_v10  ;;  %v2179_v7 = vld [vmem:[%s4423_s5 + $0x168] sm:$0xff]  ;;  %v1335_v8 = vld [vmem:[#allocation5 + $0x160] sm:$0xff]  ;;  %v83_v11 = vld [vmem:[#allocation2 + $0x58] sm:$0xff] }
  0xe6   :  { %2519 = vmatprep.mubr.msk.f32.mxu0 %vm282_vm0, %v280_v15  ;;  %v1336_v10 = vld [vmem:[#allocation5 + $0x168] sm:$0xff] }
  0xe7   :  { %2520 = vmatmul.mubr.msk.f32.gmra.mrb[14].mxu0 %vm282_vm0, %v281_v14  ;;  %v3130_v23 = vpack.c.bf16 %v1336_v10, %v1335_v8 }
 0x182   :  { %v3914_v25 = vpop.f32.mrb[0].mxu0 }
 0x183   :  { %v3916_v26 = vpop.f32.mrb[1].mxu0 }
 0x184   :  { %2554 = vmatprep.mubr.f32.mxu1 %v3916_v26  ;;  %2666 = vmatprep.mubr.f32.mxu0 %v3916_v26 }
 0x185   :  { %2555 = vmatmul.mubr.f32.vlgmr.msra.gmra.mrb[0].mxu1 %v3914_v25  ;;  %2667 = vmatmul.mubr.f32.vlgmr.msra.gmra.mrb[16].mxu0 %v3914_v25 }
 0x186   :  { %2981 = vmatpush3.bf16.msra.mxu1 %v2978_v19  ;;  %3045 = vmatpush3.bf16.msra.mxu0 %v3042_v21 }
 0x187   :  { %2983 = vmatprep.subr.bf16.mxu1 %v2982_v27  ;;  %3047 = vmatprep.subr.bf16.mxu0 %v3046_v28 }
 0x18a   :  { %v3922_v39 = vpop.f32.mrb[2].mxu0  ;;  %2985 = vmatpush3.bf16.msra.mxu1 %v2982_v27  ;;  %3049 = vmatpush3.bf16.msra.mxu0 %v3046_v28  ;;  %v1326_v27 = vld [vmem:[#allocation5 + $0x118] sm:$0xff]  ;;  %v3994_v28 = vld [vmem:[#allocation2 + $0x8] sm:$0xff] }
 0x18b   :  { %v3924_v40 = vpop.f32.mrb[3].mxu0  ;;  %2987 = vmatprep.subr.bf16.mxu1 %v2986_v33  ;;  %3051 = vmatprep.subr.bf16.mxu0 %v3050_v34  ;;  %v3110_v31 = vpack.c.bf16 %v1326_v27, %v1325_v9  ;;  %v2181_v9 = vld [vmem:[%s4423_s5 + $0x178] sm:$0xff]  ;;  %v1337_v27 = vld [vmem:[#allocation5 + $0x170] sm:$0xff] }
 0x18c   :  { %2557 = vmatprep.mubr.f32.mxu1 %v3924_v40  ;;  %2669 = vmatprep.mubr.f32.mxu0 %v3924_v40 }
 0x18d   :  { %2558 = vmatmul.mubr.f32.gmra.mrb[2].mxu1 %v3922_v39  ;;  %2670 = vmatmul.mubr.f32.gmra.mrb[18].mxu0 %v3922_v39 }
 0x18e   :  { %2989 = vmatpush3.bf16.msra.mxu1 %v2986_v33  ;;  %3053 = vmatpush3.bf16.msra.mxu0 %v3050_v34  ;;  %v2171_v33 = vld [vmem:[%s4423_s5 + $0x128] sm:$0xff]  ;;  %v1327_v34 = vld [vmem:[#allocation5 + $0x120] sm:$0xff] }
 0x18f   :  { %2991 = vmatprep.subr.bf16.mxu1 %v2990_v41  ;;  %3055 = vmatprep.subr.bf16.mxu0 %v3054_v42  ;;  %v3082_v38 = vpack.c.bf16 %v2171_v33, %v2170_v32  ;;  %v86_v32 = vld [vmem:[#allocation2 + $0x70] sm:$0xff]  ;;  %v3102_v33 = vpack.c.bf16 %v2181_v9, %v2180_v24 }
 0x192   :  { %v3930_v53 = vpop.f32.mrb[4].mxu0  ;;  %2993 = vmatpush3.bf16.msra.mxu1 %v2990_v41  ;;  %3057 = vmatpush3.bf16.msra.mxu0 %v3054_v42  ;;  %v3114_v41 = vpack.c.bf16 %v1328_v35, %v1327_v34  ;;  %v2172_v42 = vld [vmem:[%s4423_s5 + $0x130] sm:$0xff]  ;;  %v87_v35 = vld [vmem:[#allocation2 + $0x78] sm:$0xff] }
 0x193   :  { %v3932_v54 = vpop.f32.mrb[5].mxu0  ;;  %2995 = vmatprep.subr.bf16.mxu1 %v2994_v47  ;;  %3059 = vmatprep.subr.bf16.mxu0 %v3058_v48 }
 0x194   :  { %2560 = vmatprep.mubr.f32.mxu1 %v3932_v54  ;;  %2672 = vmatprep.mubr.f32.mxu0 %v3932_v54 }
 0x195   :  { %2561 = vmatmul.mubr.f32.gmra.mrb[4].mxu1 %v3930_v53  ;;  %2673 = vmatmul.mubr.f32.gmra.mrb[20].mxu0 %v3930_v53 }
 0x196   :  { %2997 = vmatpush3.bf16.msra.mxu1 %v2994_v47  ;;  %3061 = vmatpush3.bf16.msra.mxu0 %v3058_v48  ;;  %v4024_v47 = vld [vmem:[#allocation2 + $0x30] sm:$0xff]  ;;  %v3086_v48 = vpack.c.bf16 %v2173_v43, %v2172_v42 }
 0x197   :  { %2999 = vmatprep.subr.bf16.mxu1 %v2998_v55  ;;  %3063 = vmatprep.subr.bf16.mxu0 %v3062_v56 }
 0x19a   :  { %v3938_v3 = vpop.f32.mrb[6].mxu0  ;;  %3001 = vmatpush3.bf16.msra.mxu1 %v2998_v55  ;;  %3065 = vmatpush3.bf16.msra.mxu0 %v3062_v56  ;;  %v1332_v55 = vld [vmem:[#allocation5 + $0x148] sm:$0xff]  ;;  %v4034_v56 = vld [vmem:[#allocation2 + $0x38] sm:$0xff] }
 0x19b   :  { %v3940_v4 = vpop.f32.mrb[7].mxu0  ;;  %3003 = vmatprep.subr.bf16.mxu1 %v3002_v61  ;;  %3067 = vmatprep.subr.bf16.mxu0 %v3066_v62  ;;  %v3122_v59 = vpack.c.bf16 %v1332_v55, %v1331_v52 }
 0x19c   :  { %2563 = vmatprep.mubr.f32.mxu1 %v3940_v4  ;;  %2675 = vmatprep.mubr.f32.mxu0 %v3940_v4 }
 0x19d   :  { %2564 = vmatmul.mubr.f32.gmra.mrb[6].mxu1 %v3938_v3  ;;  %2676 = vmatmul.mubr.f32.gmra.mrb[22].mxu0 %v3938_v3 }
 0x19e   :  { %3005 = vmatpush3.bf16.msra.mxu1 %v3002_v61  ;;  %3069 = vmatpush3.bf16.msra.mxu0 %v3066_v62  ;;  %v2177_v61 = vld [vmem:[%s4423_s5 + $0x158] sm:$0xff]  ;;  %v1333_v62 = vld [vmem:[#allocation5 + $0x150] sm:$0xff] }
 0x19f   :  { %3007 = vmatprep.subr.bf16.mxu1 %v3006_v5  ;;  %3071 = vmatprep.subr.bf16.mxu0 %v3070_v6  ;;  %v3094_v2 = vpack.c.bf16 %v2177_v61, %v2176_v60 }
 0x1a2   :  { %v3952_v14 = vpop.f32.mrb[8].mxu0  ;;  %3009 = vmatpush3.bf16.msra.mxu1 %v3006_v5  ;;  %3073 = vmatpush3.bf16.msra.mxu0 %v3070_v6  ;;  %v3126_v5 = vpack.c.bf16 %v1334_v63, %v1333_v62  ;;  %v2178_v6 = vld [vmem:[%s4423_s5 + $0x160] sm:$0xff] }
 0x1a3   :  { %v3954_v15 = vpop.f32.mrb[9].mxu0  ;;  %3075 = vmatprep.subr.bf16.mxu1 %v3074_v12  ;;  %3107 = vmatprep.subr.bf16.mxu0 %v3106_v13 }
 0x1a4   :  { %2566 = vmatprep.mubr.f32.mxu1 %v3954_v15  ;;  %2678 = vmatprep.mubr.f32.mxu0 %v3954_v15 }
 0x1a5   :  { %2567 = vmatmul.mubr.f32.gmra.mrb[8].mxu1 %v3952_v14  ;;  %2679 = vmatmul.mubr.f32.gmra.mrb[24].mxu0 %v3952_v14 }
 0x1aa   :  { %v3960_v16 = vpop.f32.mrb[10].mxu0 }
 0x1ab   :  { %v3962_v17 = vpop.f32.mrb[11].mxu0 }
 0x1ac   :  { %2569 = vmatprep.mubr.f32.mxu1 %v3962_v17  ;;  %2681 = vmatprep.mubr.f32.mxu0 %v3962_v17 }
 0x1ad   :  { %2570 = vmatmul.mubr.f32.gmra.mrb[10].mxu1 %v3960_v16  ;;  %2682 = vmatmul.mubr.f32.gmra.mrb[26].mxu0 %v3960_v16 }
 0x1b2   :  { %v3968_v18 = vpop.f32.mrb[12].mxu0 }
 0x1b3   :  { %v3970_v19 = vpop.f32.mrb[13].mxu0 }
 0x1b4   :  { %2572 = vmatprep.mubr.f32.mxu1 %v3970_v19  ;;  %2684 = vmatprep.mubr.f32.mxu0 %v3970_v19 }
 0x1b5   :  { %2573 = vmatmul.mubr.f32.gmra.mrb[12].mxu1 %v3968_v18  ;;  %2685 = vmatmul.mubr.f32.gmra.mrb[28].mxu0 %v3968_v18 }
 0x1ba   :  { %v3976_v20 = vpop.f32.mrb[14].mxu0 }
 0x1bb   :  { %v3978_v21 = vpop.f32.mrb[15].mxu0 }
 0x1bc   :  { %2575 = vmatprep.mubr.f32.mxu1 %v3978_v21  ;;  %2687 = vmatprep.mubr.f32.mxu0 %v3978_v21 }
 0x1bd   :  { %2576 = vmatmul.mubr.f32.gmra.mrb[14].mxu1 %v3976_v20  ;;  %2688 = vmatmul.mubr.f32.gmra.mrb[30].mxu0 %v3976_v20 }
 0x1be   :  { %2610 = vmatprep.mubr.f32.mxu1 %v3980_v22  ;;  %2722 = vmatprep.mubr.f32.mxu0 %v3980_v22 }
 0x1c1   :  { %2611 = vmatmul.mubr.f32.vlgmr.msra.gmra.mrb[0].mxu1 %v3994_v28  ;;  %2723 = vmatmul.mubr.f32.vlgmr.msra.gmra.mrb[16].mxu0 %v3994_v28 }
 0x1c2   :  { %3077 = vmatpush3.bf16.msra.mxu1 %v3074_v12  ;;  %3109 = vmatpush3.bf16.msra.mxu0 %v3106_v13  ;;  %v84_v12 = vld [vmem:[#allocation2 + $0x60] sm:$0xff]  ;;  %v3098_v13 = vpack.c.bf16 %v2179_v7, %v2178_v6 }
 0x1c3   :  { %2613 = vmatprep.mubr.f32.mxu1 %v3996_v29  ;;  %2725 = vmatprep.mubr.f32.mxu0 %v3996_v29 }
 0x1c4   :  { %3079 = vmatprep.subr.bf16.mxu1 %v3078_v30  ;;  %3111 = vmatprep.subr.bf16.mxu0 %v3110_v31 }
 0x1c5   :  { %2614 = vmatmul.mubr.f32.gmra.mrb[2].mxu1 %v4006_v36  ;;  %2726 = vmatmul.mubr.f32.gmra.mrb[18].mxu0 %v4006_v36 }
 0x1c6   :  { %3081 = vmatpush3.bf16.msra.mxu1 %v3078_v30  ;;  %3113 = vmatpush3.bf16.msra.mxu0 %v3110_v31  ;;  %v1338_v30 = vld [vmem:[#allocation5 + $0x178] sm:$0xff]  ;;  %v85_v31 = vld [vmem:[#allocation2 + $0x68] sm:$0xff] }
 0x1c7   :  { %2616 = vmatprep.mubr.f32.mxu1 %v4010_v37  ;;  %2728 = vmatprep.mubr.f32.mxu0 %v4010_v37  ;;  %v3134_v34 = vpack.c.bf16 %v1338_v30, %v1337_v27 }
 0x1c8   :  { %3083 = vmatprep.subr.bf16.mxu1 %v3082_v38  ;;  %3115 = vmatprep.subr.bf16.mxu0 %v3114_v41 }
 0x1c9   :  { %2617 = vmatmul.mubr.f32.gmra.mrb[4].mxu1 %v4020_v46  ;;  %2729 = vmatmul.mubr.f32.gmra.mrb[20].mxu0 %v4020_v46 }
 0x1ca   :  { %3085 = vmatpush3.bf16.msra.mxu1 %v3082_v38  ;;  %3117 = vmatpush3.bf16.msra.mxu0 %v3114_v41 }
 0x1cb   :  { %2619 = vmatprep.mubr.f32.mxu1 %v4024_v47  ;;  %2731 = vmatprep.mubr.f32.mxu0 %v4024_v47 }
 0x1cc   :  { %3087 = vmatprep.subr.bf16.mxu1 %v3086_v48  ;;  %3119 = vmatprep.subr.bf16.mxu0 %v3118_v49 }
 0x1cd   :  { %2620 = vmatmul.mubr.f32.gmra.mrb[6].mxu1 %v4034_v56  ;;  %2732 = vmatmul.mubr.f32.gmra.mrb[22].mxu0 %v4034_v56 }
 0x1ce   :  { %3089 = vmatpush3.bf16.msra.mxu1 %v3086_v48  ;;  %3121 = vmatpush3.bf16.msra.mxu0 %v3118_v49 }
 0x1cf   :  { %2622 = vmatprep.mubr.f32.mxu1 %v4038_v57  ;;  %2734 = vmatprep.mubr.f32.mxu0 %v4038_v57 }
 0x1d0   :  { %3091 = vmatprep.subr.bf16.mxu1 %v3090_v58  ;;  %3123 = vmatprep.subr.bf16.mxu0 %v3122_v59 }
 0x1d1   :  { %2623 = vmatmul.mubr.f32.gmra.mrb[8].mxu1 %v4048_v0  ;;  %2735 = vmatmul.mubr.f32.gmra.mrb[24].mxu0 %v4048_v0 }
 0x1d2   :  { %3093 = vmatpush3.bf16.msra.mxu1 %v3090_v58  ;;  %3125 = vmatpush3.bf16.msra.mxu0 %v3122_v59 }
 0x1d3   :  { %2625 = vmatprep.mubr.f32.mxu1 %v4052_v1  ;;  %2737 = vmatprep.mubr.f32.mxu0 %v4052_v1 }
 0x1d4   :  { %3095 = vmatprep.subr.bf16.mxu1 %v3094_v2  ;;  %3127 = vmatprep.subr.bf16.mxu0 %v3126_v5 }
 0x1d5   :  { %2626 = vmatmul.mubr.f32.gmra.mrb[10].mxu1 %v83_v11  ;;  %2738 = vmatmul.mubr.f32.gmra.mrb[26].mxu0 %v83_v11 }
 0x1d6   :  { %3097 = vmatpush3.bf16.msra.mxu1 %v3094_v2  ;;  %3129 = vmatpush3.bf16.msra.mxu0 %v3126_v5 }
 0x1d7   :  { %2628 = vmatprep.mubr.f32.mxu1 %v84_v12  ;;  %2740 = vmatprep.mubr.f32.mxu0 %v84_v12 }
 0x1d8   :  { %3099 = vmatprep.subr.bf16.mxu1 %v3098_v13  ;;  %3131 = vmatprep.subr.bf16.mxu0 %v3130_v23 }
 0x1d9   :  { %2629 = vmatmul.mubr.f32.gmra.mrb[12].mxu1 %v85_v31  ;;  %2741 = vmatmul.mubr.f32.gmra.mrb[28].mxu0 %v85_v31 }
 0x1da   :  { %3101 = vmatpush3.bf16.msra.mxu1 %v3098_v13  ;;  %3133 = vmatpush3.bf16.msra.mxu0 %v3130_v23 }
 0x1db   :  { %2631 = vmatprep.mubr.f32.mxu1 %v86_v32  ;;  %2743 = vmatprep.mubr.f32.mxu0 %v86_v32 }
 0x1dc   :  { %3103 = vmatprep.subr.bf16.mxu1 %v3102_v33  ;;  %3135 = vmatprep.subr.bf16.mxu0 %v3134_v34 }
 0x1dd   :  { %2632 = vmatmul.mubr.f32.gmra.mrb[14].mxu1 %v87_v35  ;;  %2744 = vmatmul.mubr.f32.gmra.mrb[30].mxu0 %v87_v35 }
 0x1de   :  { %3105 = vmatpush3.bf16.msra.mxu1 %v3102_v33  ;;  %2778 = vmatprep.mubr.f32.mxu1 %v3916_v26  ;;  %v2144_v26 = vld [vmem:[%s4425_s7] ss:$0 sm:$0xff] }
 0x1df   :  { %3137 = vmatpush3.bf16.msra.mxu0 %v3134_v34  ;;  %2834 = vmatprep.mubr.f32.mxu0 %v3980_v22 }
 0x1e1   :  { %2779 = vmatmul.mubr.f32.vlgmr.msra.gmra.mrb[16].mxu1 %v3914_v25  ;;  %v3459_v25 = vld [vmem:[%s4420_s2] sm:$0xff] }
 0x1e2   :  { %2835 = vmatmul.mubr.f32.vlgmr.msra.gmra.mrb[32].mxu0 %v3994_v28  ;;  %2781 = vmatprep.mubr.f32.mxu1 %v3924_v40  ;;  %v2163_v40 = vld [vmem:[%s4425_s7 + $0x1] ss:$0 sm:$0xff] }
 0x1e3   :  { %2837 = vmatprep.mubr.f32.mxu0 %v3996_v29 }
 0x1e5   :  { %2782 = vmatmul.mubr.f32.gmra.mrb[18].mxu1 %v3922_v39  ;;  %v2145_v39 = vld [vmem:[%s4426_s8] ss:$0 sm:$0xff] }
 0x1e6   :  { %2838 = vmatmul.mubr.f32.gmra.mrb[34].mxu0 %v4006_v36  ;;  %2784 = vmatprep.mubr.f32.mxu1 %v3932_v54 }
 0x1e7   :  { %2840 = vmatprep.mubr.f32.mxu0 %v4010_v37 }
 0x1e9   :  { %2785 = vmatmul.mubr.f32.gmra.mrb[20].mxu1 %v3930_v53  ;;  %v2165_v53 = vld [vmem:[%s4426_s8 + $0x1] ss:$0 sm:$0xff] }
 0x1ea   :  { %2841 = vmatmul.mubr.f32.gmra.mrb[36].mxu0 %v4020_v46  ;;  %2787 = vmatprep.mubr.f32.mxu1 %v3940_v4 }
 0x1eb   :  { %2843 = vmatprep.mubr.f32.mxu0 %v4024_v47 }
 0x1ed   :  { %2788 = vmatmul.mubr.f32.gmra.mrb[22].mxu1 %v3938_v3 }
 0x1ee   :  { %2844 = vmatmul.mubr.f32.gmra.mrb[38].mxu0 %v4034_v56  ;;  %2790 = vmatprep.mubr.f32.mxu1 %v3954_v15 }
 0x1ef   :  { %2846 = vmatprep.mubr.f32.mxu0 %v4038_v57 }
 0x1f1   :  { %2791 = vmatmul.mubr.f32.gmra.mrb[24].mxu1 %v3952_v14  ;;  %v4112_v14 = vadd.f32 %v2145_v39, %v2144_v26 }
 0x1f2   :  { %2847 = vmatmul.mubr.f32.gmra.mrb[40].mxu0 %v4048_v0  ;;  %2793 = vmatprep.mubr.f32.mxu1 %v3962_v17 }
 0x1f3   :  { %2849 = vmatprep.mubr.f32.mxu0 %v4052_v1 }
 0x1f5   :  { %2794 = vmatmul.mubr.f32.gmra.mrb[26].mxu1 %v3960_v16  ;;  %v4114_v16 = vadd.f32 %v2165_v53, %v2163_v40 }
 0x1f6   :  { %2850 = vmatmul.mubr.f32.gmra.mrb[42].mxu0 %v83_v11  ;;  %2796 = vmatprep.mubr.f32.mxu1 %v3970_v19 }
 0x1f7   :  { %2852 = vmatprep.mubr.f32.mxu0 %v84_v12 }
 0x1f9   :  { %2797 = vmatmul.mubr.f32.gmra.mrb[28].mxu1 %v3968_v18 }
 0x1fa   :  { %2853 = vmatmul.mubr.f32.gmra.mrb[44].mxu0 %v85_v31  ;;  %2799 = vmatprep.mubr.f32.mxu1 %v3978_v21 }
 0x1fb   :  { %2855 = vmatprep.mubr.f32.mxu0 %v86_v32 }
 0x1fd   :  { %2800 = vmatmul.mubr.f32.gmra.mrb[30].mxu1 %v3976_v20 }
 0x1fe   :  { %2856 = vmatmul.mubr.f32.gmra.mrb[46].mxu0 %v87_v35  ;;  %2890 = vmatprep.mubr.f32.mxu1 %v3459_v25 }
 0x294   :  { %v2612_v54 = vpop.f32.mrb[0].mxu1  ;;  %v2724_v3 = vpop.f32.mrb[16].mxu0 }
 0x295   :  { %v3194_v4 = vadd.f32 %v2612_v54, %v2144_v26  ;;  %v3226_v15 = vadd.f32 %v2724_v3, %v2163_v40  ;;  %v733_v17 = vpop.f32.mrb[1].mxu1  ;;  %v1073_v18 = vpop.f32.mrb[17].mxu0 }
 0x296   :  { %v3196_v19 = vadd.f32 %v2144_v26, %v733_v17  ;;  %v3228_v20 = vadd.f32 %v2163_v40, %v1073_v18 }
 0x297   :  { %v3195_v21 = vadd.f32 %v3194_v4, %v2145_v39  ;;  %v3227_v38 = vadd.f32 %v3226_v15, %v2165_v53 }
 0x298   :  { %v3197_v41 = vadd.f32 %v3196_v19, %v2145_v39  ;;  %v3229_v42 = vadd.f32 %v3228_v20, %v2165_v53  ;;  %v2615_v43 = vpop.f32.mrb[2].mxu1  ;;  %v2727_v44 = vpop.f32.mrb[18].mxu0 }
 0x299   :  { %v2187_v45 = vmul.f32 -1.442695, %v3195_v21  ;;  %v2203_v47 = vmul.f32 -1.442695, %v3227_v38  ;;  %v3199_v48 = vadd.f32 %v4112_v14, %v2615_v43  ;;  %v3231_v49 = vadd.f32 %v4114_v16, %v2727_v44  ;;  %v743_v50 = vpop.f32.mrb[3].mxu1  ;;  %v1083_v51 = vpop.f32.mrb[19].mxu0 }
 0x29a   :  { %v2186_v52 = vmul.f32 -1.442695, %v3197_v41  ;;  %v2202_v55 = vmul.f32 -1.442695, %v3229_v42  ;;  %v3201_v57 = vadd.f32 %v4112_v14, %v743_v50  ;;  %v3233_v58 = vadd.f32 %v4114_v16, %v1083_v51 }
 0x29b   :  { %3299 = vpow2.f32 %v2187_v45  ;;  %v2189_v59 = vmul.f32 -1.442695, %v3199_v48  ;;  %v2205_v60 = vmul.f32 -1.442695, %v3231_v49 }
 0x29c   :  { %3301 = vpow2.f32 %v2203_v47  ;;  %v2618_v61 = vpop.f32.mrb[4].mxu1  ;;  %v2730_v62 = vpop.f32.mrb[20].mxu0  ;;  %v2188_v63 = vmul.f32 -1.442695, %v3201_v57  ;;  %v2204_v5 = vmul.f32 -1.442695, %v3233_v58 }
 0x29d   :  { %3303 = vpow2.f32 %v2186_v52  ;;  %v3203_v0 = vadd.f32 %v4112_v14, %v2618_v61  ;;  %v753_v1 = vpop.f32.mrb[5].mxu1  ;;  %v1093_v2 = vpop.f32.mrb[21].mxu0  ;;  %v3235_v8 = vadd.f32 %v4114_v16, %v2730_v62 }
 0x29e   :  { %3305 = vpow2.f32 %v2202_v55  ;;  %v3205_v6 = vadd.f32 %v4112_v14, %v753_v1  ;;  %v3237_v13 = vadd.f32 %v4114_v16, %v1093_v2 }
 0x29f   :  { %3307 = vpow2.f32 %v2189_v59  ;;  %v2191_v7 = vmul.f32 -1.442695, %v3203_v0  ;;  %v2207_v30 = vmul.f32 -1.442695, %v3235_v8 }
 0x2a0   :  { %3309 = vpow2.f32 %v2205_v60  ;;  %v2621_v10 = vpop.f32.mrb[6].mxu1  ;;  %v2733_v11 = vpop.f32.mrb[22].mxu0  ;;  %v2190_v12 = vmul.f32 -1.442695, %v3205_v6  ;;  %v2206_v34 = vmul.f32 -1.442695, %v3237_v13 }
 0x2a1   :  { %3311 = vpow2.f32 %v2188_v63  ;;  %v3207_v23 = vadd.f32 %v4112_v14, %v2621_v10  ;;  %v763_v24 = vpop.f32.mrb[7].mxu1  ;;  %v1103_v9 = vpop.f32.mrb[23].mxu0  ;;  %v3239_v45 = vadd.f32 %v4114_v16, %v2733_v11 }
 0x2a2   :  { %3313 = vpow2.f32 %v2204_v5  ;;  %v3209_v50 = vadd.f32 %v4112_v14, %v763_v24  ;;  %v3241_v59 = vadd.f32 %v4114_v16, %v1103_v9 }
 0x2a3   :  { %3315 = vpow2.f32 %v2191_v7  ;;  %v2193_v27 = vmul.f32 -1.442695, %v3207_v23  ;;  %v2209_v61 = vmul.f32 -1.442695, %v3239_v45 }
 0x2a4   :  { %v2624_v31 = vpop.f32.mrb[8].mxu1  ;;  %v2736_v32 = vpop.f32.mrb[24].mxu0  ;;  %3317 = vpow2.f32 %v2190_v12  ;;  %v2192_v1 = vmul.f32 -1.442695, %v3209_v50  ;;  %v2208_v24 = vmul.f32 -1.442695, %v3241_v59 }
 0x2a5   :  { %v3300_v33 = vpop.eup %3299  ;;  %v773_v35 = vpop.f32.mrb[9].mxu1  ;;  %3319 = vpow2.f32 %v2193_v27  ;;  %v3211_v62 = vadd.f32 %v4112_v14, %v2624_v31  ;;  %v3243_v2 = vadd.f32 %v4114_v16, %v2736_v32  ;;  %v4153_v27 = vld [vmem:[%s4426_s8 + $0x2] ss:$0 sm:$0xff] }
 0x2a6   :  { %v1113_v25 = vpop.f32.mrb[25].mxu0  ;;  %v3302_v26 = vpop.eup %3301  ;;  %v1557_v39 = vadd.f32 1.0, %v3300_v33  ;;  %3321 = vpow2.f32 %v2207_v30  ;;  %v3213_v5 = vadd.f32 %v4112_v14, %v773_v35  ;;  %v4158_v33 = vld [vmem:[%s4425_s7 + $0x2] ss:$0 sm:$0xff] }
 0x2a7   :  { %v3304_v40 = vpop.eup %3303  ;;  %v1669_v53 = vadd.f32 1.0, %v3302_v26  ;;  %3323 = vpow2.f32 %v2206_v34  ;;  %v3245_v11 = vadd.f32 %v4114_v16, %v1113_v25  ;;  %v2195_v31 = vmul.f32 -1.442695, %v3211_v62 }
 0x2a8   :  { %v3306_v54 = vpop.eup %3305  ;;  %v1556_v3 = vadd.f32 1.0, %v3304_v40  ;;  %v2627_v4 = vpop.f32.mrb[10].mxu1  ;;  %3325 = vrcp.f32 %v1557_v39  ;;  %v2211_v35 = vmul.f32 -1.442695, %v3243_v2  ;;  %v2194_v25 = vmul.f32 -1.442695, %v3213_v5 }
 0x2a9   :  { %v3308_v15 = vpop.eup %3307  ;;  %v1668_v17 = vadd.f32 1.0, %v3306_v54  ;;  %v2739_v18 = vpop.f32.mrb[26].mxu0  ;;  %3327 = vrcp.f32 %v1669_v53  ;;  %v3215_v12 = vadd.f32 %v4112_v14, %v2627_v4  ;;  %v2210_v54 = vmul.f32 -1.442695, %v3245_v11 }
 0x2aa   :  { %v783_v19 = vpop.f32.mrb[11].mxu1  ;;  %v3310_v20 = vpop.eup %3309  ;;  %v1559_v21 = vadd.f32 1.0, %v3308_v15  ;;  %3329 = vrcp.f32 %v1556_v3  ;;  %v3247_v9 = vadd.f32 %v4114_v16, %v2739_v18 }
 0x2ab   :  { %v4125_v38 = vpop.f32.mrb[27].mxu0  ;;  %v3312_v41 = vpop.eup %3311  ;;  %v1671_v42 = vadd.f32 1.0, %v3310_v20  ;;  %3331 = vrcp.f32 %v1668_v17  ;;  %v3217_v26 = vadd.f32 %v4112_v14, %v783_v19  ;;  %v2197_v3 = vmul.f32 -1.442695, %v3215_v12 }
 0x2ac   :  { %v3314_v43 = vpop.eup %3313  ;;  %v1558_v44 = vadd.f32 1.0, %v3312_v41  ;;  %v2630_v47 = vpop.f32.mrb[12].mxu1  ;;  %3333 = vrcp.f32 %v1559_v21  ;;  %v2213_v18 = vmul.f32 -1.442695, %v3247_v9  ;;  %v3249_v20 = vadd.f32 %v4114_v16, %v4125_v38 }
 0x2ad   :  { %v3316_v48 = vpop.eup %3315  ;;  %v1670_v49 = vadd.f32 1.0, %v3314_v43  ;;  %v4129_v51 = vpop.f32.mrb[28].mxu0  ;;  %3335 = vrcp.f32 %v1671_v42  ;;  %v3219_v19 = vadd.f32 %v4112_v14, %v2630_v47 }
 0x2ae   :  { %v4131_v52 = vpop.f32.mrb[13].mxu1  ;;  %v1561_v55 = vadd.f32 1.0, %v3316_v48  ;;  %v4133_v57 = vpop.f32.mrb[29].mxu0  ;;  %3337 = vrcp.f32 %v1558_v44  ;;  %v2196_v48 = vmul.f32 -1.442695, %v3217_v26  ;;  %v3251_v59 = vadd.f32 %v4114_v16, %v4129_v51 }
 0x2af   :  { %v3318_v58 = vpop.eup %3317  ;;  %3339 = vrcp.f32 %v1670_v49 }
 0x2b0   :  { %v1560_v60 = vadd.f32 1.0, %v3318_v58  ;;  %v4137_v63 = vpop.f32.mrb[14].mxu1  ;;  %v3320_v0 = vpop.eup %3319  ;;  %3341 = vrcp.f32 %v1561_v55 }
 0x2b1   :  { %v4141_v6 = vpop.f32.mrb[30].mxu0  ;;  %v4143_v7 = vpop.f32.mrb[15].mxu1  ;;  %v1563_v10 = vadd.f32 1.0, %v3320_v0 }
 0x2b2   :  { %v3322_v8 = vpop.eup %3321  ;;  %v4147_v13 = vpop.f32.mrb[31].mxu0  ;;  %3343 = vrcp.f32 %v1560_v60 }
 0x2b3   :  { %v3324_v23 = vpop.eup %3323  ;;  %3345 = vrcp.f32 %v1563_v10  ;;  %v1673_v0 = vadd.f32 1.0, %v3322_v8  ;;  %v2199_v10 = vmul.f32 -1.442695, %v3219_v19 }
 0x2b4   :  { %v3326_v30 = vpop.eup %3325  ;;  %v2780_v32 = vpop.f32.mrb[16].mxu1  ;;  %3347 = vpow2.f32 %v2209_v61  ;;  %v1672_v9 = vadd.f32 1.0, %v3324_v23 }
 0x2b5   :  { %v4160_v34 = vpop.eup %3327  ;;  %v2836_v39 = vpop.f32.mrb[32].mxu0  ;;  %3349 = vpow2.f32 %v2192_v1  ;;  %v1249_v42 = vadd.f32 %v2780_v32, %v4158_v33 }
 0x2b6   :  { %v1243_v40 = vpop.f32.mrb[17].mxu1  ;;  %v3330_v53 = vpop.eup %3329  ;;  %v1419_v4 = vadd.f32 %v2836_v39, %v4153_v27  ;;  %3351 = vpow2.f32 %v2208_v24 }
 0x2b7   :  { %v1413_v15 = vpop.f32.mrb[33].mxu0  ;;  %v4164_v17 = vpop.eup %3331  ;;  %3353 = vpow2.f32 %v2195_v31  ;;  %v1244_v49 = vadd.f32 %v4158_v33, %v1243_v40 }
 0x2b8   :  { %v1414_v21 = vadd.f32 %v4153_v27, %v1413_v15  ;;  %v3334_v41 = vpop.eup %3333  ;;  %v1717_v43 = vmul.f32 %v3326_v30, %v1419_v4  ;;  %v2783_v44 = vpop.f32.mrb[18].mxu1  ;;  %3355 = vpow2.f32 %v2211_v35  ;;  %v2215_v4 = vmul.f32 -1.442695, %v3251_v59 }
 0x2b9   :  { %v4171_v45 = vpop.eup %3335  ;;  %v2839_v55 = vpop.f32.mrb[34].mxu0  ;;  %3357 = vpow2.f32 %v2194_v25  ;;  %v1259_v11 = vadd.f32 %v2783_v44, %v4158_v33  ;;  %v2212_v25 = vmul.f32 -1.442695, %v3249_v20 }
 0x2ba   :  { %v1716_v50 = vmul.f32 %v3330_v53, %v1414_v21  ;;  %v1253_v58 = vpop.f32.mrb[19].mxu1  ;;  %v3338_v38 = vpop.eup %3337  ;;  %v4176_v60 = vadd.f32 %v1717_v43, %v1249_v42  ;;  %v1429_v47 = vadd.f32 %v2839_v55, %v4153_v27  ;;  %3359 = vpow2.f32 %v2210_v54 }
 0x2bb   :  { %v1423_v61 = vpop.f32.mrb[35].mxu0  ;;  %v4179_v62 = vpop.eup %3339  ;;  %3361 = vpow2.f32 %v2197_v3  ;;  %v1254_v30 = vadd.f32 %v4158_v33, %v1253_v58 }
 0x2bc   :  { %v4181_v1 = vadd.f32 %v1716_v50, %v1244_v49  ;;  %v1424_v2 = vadd.f32 %v4153_v27, %v1423_v61  ;;  %v3342_v5 = vpop.eup %3341  ;;  %v1719_v12 = vmul.f32 %v3334_v41, %v1429_v47  ;;  %v2786_v51 = vpop.f32.mrb[20].mxu1  ;;  %3363 = vpow2.f32 %v2213_v18 }
 0x2bd   :  { %v3344_v24 = vpop.eup %3343  ;;  %v2842_v32 = vpop.f32.mrb[36].mxu0  ;;  %3365 = vpow2.f32 %v2196_v48  ;;  %v1269_v15 = vadd.f32 %v2786_v51, %v4158_v33 }
 0x2be   :  { %v1718_v31 = vmul.f32 %v3338_v38, %v1424_v2  ;;  %v1263_v8 = vpop.f32.mrb[21].mxu1  ;;  %v3346_v35 = vpop.eup %3345  ;;  %v4186_v26 = vadd.f32 %v1719_v12, %v1259_v11  ;;  %v1439_v39 = vadd.f32 %v2842_v32, %v4153_v27  ;;  %3367 = vrcp.f32 %v1673_v0 }
 0x2bf   :  { %v1433_v40 = vpop.f32.mrb[37].mxu0  ;;  %v3348_v53 = vpop.eup %3347  ;;  %3369 = vpow2.f32 %v2199_v10  ;;  %v1264_v19 = vadd.f32 %v4158_v33, %v1263_v8 }
 0x2c0   :  { %v4189_v54 = vadd.f32 %v1718_v31, %v1254_v30  ;;  %v1434_v23 = vadd.f32 %v4153_v27, %v1433_v40  ;;  %v3350_v3 = vpop.eup %3349  ;;  %v1721_v18 = vmul.f32 %v3342_v5, %v1439_v39  ;;  %v2789_v21 = vpop.f32.mrb[22].mxu1  ;;  %3371 = vrcp.f32 %v1672_v9 }
 0x2c1   :  { %v3352_v41 = vpop.eup %3351  ;;  %v1562_v20 = vadd.f32 1.0, %v3350_v3  ;;  %v2845_v43 = vpop.f32.mrb[38].mxu0  ;;  %v1675_v49 = vadd.f32 1.0, %v3348_v53  ;;  %3373 = vpow2.f32 %v2212_v25  ;;  %v1279_v2 = vadd.f32 %v2789_v21, %v4158_v33 }
 0x2c2   :  { %v1720_v42 = vmul.f32 %v3344_v24, %v1434_v23  ;;  %v4194_v44 = vpop.f32.mrb[23].mxu1  ;;  %v3354_v48 = vpop.eup %3353  ;;  %v4196_v50 = vadd.f32 %v1721_v18, %v1269_v15  ;;  %v1449_v55 = vadd.f32 %v2845_v43, %v4153_v27  ;;  %v1674_v0 = vadd.f32 1.0, %v3352_v41 }
 0x2c3   :  { %v1443_v58 = vpop.f32.mrb[39].mxu0  ;;  %v3356_v38 = vpop.eup %3355  ;;  %3375 = vrcp.f32 %v1562_v20  ;;  %v1565_v59 = vadd.f32 1.0, %v3354_v48  ;;  %v3221_v31 = vadd.f32 %v4112_v14, %v4131_v52  ;;  %v3253_v53 = vadd.f32 %v4114_v16, %v4133_v57 }
 0x2c4   :  { %v4199_v47 = vadd.f32 %v1720_v42, %v1264_v19  ;;  %v3358_v61 = vpop.eup %3357  ;;  %3377 = vpow2.f32 %v2215_v4  ;;  %v1723_v5 = vmul.f32 %v3346_v35, %v1449_v55  ;;  %v2792_v10 = vpop.f32.mrb[24].mxu1  ;;  %v1677_v30 = vadd.f32 1.0, %v3356_v38 }
 0x2c5   :  { %v3360_v11 = vpop.eup %3359  ;;  %3379 = vrcp.f32 %v1565_v59  ;;  %v1564_v12 = vadd.f32 1.0, %v3358_v61  ;;  %v2848_v51 = vpop.f32.mrb[40].mxu0  ;;  %v3223_v52 = vadd.f32 %v4112_v14, %v4137_v63  ;;  %v3255_v15 = vadd.f32 %v4114_v16, %v4141_v6 }
 0x2c6   :  { %v4202_v24 = vpop.f32.mrb[25].mxu1  ;;  %v3362_v9 = vpop.eup %3361  ;;  %3381 = vrcp.f32 %v1675_v49  ;;  %v4206_v32 = vadd.f32 %v1723_v5, %v1279_v2  ;;  %v1676_v40 = vadd.f32 1.0, %v3360_v11  ;;  %v2198_v19 = vmul.f32 -1.442695, %v3221_v31 }
 0x2c7   :  { %v1453_v8 = vpop.f32.mrb[41].mxu0  ;;  %v3364_v25 = vpop.eup %3363  ;;  %3383 = vrcp.f32 %v1564_v12  ;;  %v1567_v39 = vadd.f32 1.0, %v3362_v9  ;;  %v1444_v57 = vadd.f32 %v4153_v27, %v1443_v58  ;;  %v3225_v63 = vadd.f32 %v4112_v14, %v4143_v7 }
 0x2c8   :  { %v3366_v35 = vpop.eup %3365  ;;  %3385 = vrcp.f32 %v1674_v0  ;;  %v2795_v23 = vpop.f32.mrb[26].mxu1  ;;  %v1679_v20 = vadd.f32 1.0, %v3364_v25  ;;  %v3257_v6 = vadd.f32 %v4114_v16, %v4147_v13  ;;  %v2214_v55 = vmul.f32 -1.442695, %v3253_v53 }
 0x2c9   :  { %v4210_v3 = vpop.eup %3367  ;;  %3387 = vrcp.f32 %v1567_v39  ;;  %v1566_v4 = vadd.f32 1.0, %v3366_v35  ;;  %v2851_v18 = vpop.f32.mrb[42].mxu0  ;;  %v1459_v38 = vadd.f32 %v2848_v51, %v4153_v27  ;;  %v2201_v58 = vmul.f32 -1.442695, %v3223_v52 }
 0x2ca   :  { %v4216_v21 = vpop.f32.mrb[27].mxu1  ;;  %v3370_v41 = vpop.eup %3369  ;;  %3389 = vrcp.f32 %v1677_v30  ;;  %v2217_v0 = vmul.f32 -1.442695, %v3255_v15  ;;  %v1274_v14 = vadd.f32 %v4158_v33, %v4194_v44  ;;  %v1454_v16 = vadd.f32 %v4153_v27, %v1453_v8 }
 0x2cb   :  { %v1463_v42 = vpop.f32.mrb[43].mxu0  ;;  %v4219_v43 = vpop.eup %3371  ;;  %3391 = vrcp.f32 %v1566_v4  ;;  %v1569_v48 = vadd.f32 1.0, %v3370_v41  ;;  %v2200_v51 = vmul.f32 -1.442695, %v3225_v63  ;;  %v2216_v9 = vmul.f32 -1.442695, %v3257_v6 }
 0x2cc   :  { %v3374_v49 = vpop.eup %3373  ;;  %3393 = vrcp.f32 %v1676_v40  ;;  %v2798_v59 = vpop.f32.mrb[28].mxu1  ;;  %v1289_v30 = vadd.f32 %v2792_v10, %v4158_v33  ;;  %v1469_v35 = vadd.f32 %v2851_v18, %v4153_v27  ;;  %v1284_v8 = vadd.f32 %v4158_v33, %v4202_v24 }
 0x2cd   :  { %v3376_v61 = vpop.eup %3375  ;;  %3395 = vrcp.f32 %v1569_v48  ;;  %v2854_v2 = vpop.f32.mrb[44].mxu0  ;;  %v1464_v41 = vadd.f32 %v4153_v27, %v1463_v42 }
 0x2ce   :  { %v4226_v5 = vpop.f32.mrb[29].mxu1  ;;  %v3378_v11 = vpop.eup %3377  ;;  %3397 = vrcp.f32 %v1679_v20  ;;  %v1722_v7 = vmul.f32 %v3376_v61, %v1444_v57  ;;  %v1479_v63 = vadd.f32 %v2854_v2, %v4153_v27 }
 0x2cf   :  { %v4231_v13 = vpop.f32.mrb[45].mxu0  ;;  %v3380_v12 = vpop.eup %3379  ;;  %3399 = vpow2.f32 %v2198_v19  ;;  %v1299_v19 = vadd.f32 %v2795_v23, %v4158_v33  ;;  %v1294_v23 = vadd.f32 %v4158_v33, %v4216_v21 }
 0x2d0   :  { %v4234_v31 = vpop.eup %3381  ;;  %3401 = vpow2.f32 %v2214_v55  ;;  %v4236_v25 = vadd.f32 %v1722_v7, %v1274_v14  ;;  %v1725_v39 = vmul.f32 %v3380_v12, %v1459_v38  ;;  %v4239_v44 = vpop.f32.mrb[30].mxu1 }
 0x2d1   :  { %v3384_v40 = vpop.eup %3383  ;;  %3403 = vpow2.f32 %v2201_v58  ;;  %v4243_v53 = vpop.f32.mrb[46].mxu0 }
 0x2d2   :  { %v4245_v4 = vpop.f32.mrb[31].mxu1  ;;  %v4247_v10 = vpop.eup %3385  ;;  %3405 = vpow2.f32 %v2217_v0  ;;  %v4249_v52 = vadd.f32 %v1725_v39, %v1289_v30  ;;  %v1724_v15 = vmul.f32 %v3384_v40, %v1454_v16 }
 0x2d3   :  { %v4252_v18 = vpop.f32.mrb[47].mxu0  ;;  %v3388_v20 = vpop.eup %3387  ;;  %3407 = vpow2.f32 %v2200_v51  ;;  %v1681_v51 = vadd.f32 1.0, %v3378_v11  ;;  %v1766_v11 = vsub.f32 1.0, %v4179_v62 }
 0x2d4   :  { %v4255_v57 = vpop.eup %3389  ;;  %3409 = vpow2.f32 %v2216_v9  ;;  %v4257_v24 = vadd.f32 %v1724_v15, %v1284_v8  ;;  %v1727_v48 = vmul.f32 %v3388_v20, %v1469_v35  ;;  %v1796_v9 = vmul.f32 %v4164_v17, %v3980_v22 }
 0x2d5   :  { %v3392_v6 = vpop.eup %3391  ;;  %3411 = vtanh.f32 %v4176_v60  ;;  %v1309_v60 = vadd.f32 %v2798_v59, %v4158_v33  ;;  %v1797_v59 = vmul.f32 %v4160_v34, %v3994_v28  ;;  %v1798_v28 = vmul.f32 %v4179_v62, %v3996_v29 }
 0x2d6   :  { %v4261_v55 = vpop.eup %3393  ;;  %3413 = vtanh.f32 %v4181_v1  ;;  %v4264_v42 = vadd.f32 %v1727_v48, %v1299_v19  ;;  %v1726_v38 = vmul.f32 %v3392_v6, %v1464_v41  ;;  %v1678_v1 = vadd.f32 1.0, %v3374_v49 }
 0x2d7   :  { %v3396_v61 = vpop.eup %3395  ;;  %3415 = vtanh.f32 %v4186_v26  ;;  %v1765_v26 = vsub.f32 1.0, %v4160_v34  ;;  %v1769_v34 = vsub.f32 1.0, %v4210_v3  ;;  %v1768_v22 = vsub.f32 1.0, %v4219_v43 }
 0x2d8   :  { %v4269_v58 = vpop.eup %3397  ;;  %3417 = vtanh.f32 %v4189_v54  ;;  %v4272_v0 = vadd.f32 %v1726_v38, %v1294_v23  ;;  %v1729_v2 = vmul.f32 %v3396_v61, %v1479_v63  ;;  %v1764_v54 = vsub.f32 1.0, %v4164_v17 }
 0x2d9   :  { %v3400_v14 = vpop.eup %3399  ;;  %3419 = vtanh.f32 %v4196_v50  ;;  %v1800_v17 = vmul.f32 %v4219_v43, %v4010_v37  ;;  %v1801_v15 = vmul.f32 %v4210_v3, %v4020_v46  ;;  %v1803_v29 = vmul.f32 %v4234_v31, %v4034_v56 }
 0x2da   :  { %v3402_v7 = vpop.eup %3401  ;;  %v1568_v16 = vadd.f32 1.0, %v3400_v14  ;;  %3421 = vtanh.f32 %v4199_v47  ;;  %v4277_v21 = vadd.f32 %v1729_v2, %v1309_v60  ;;  %v1767_v47 = vsub.f32 1.0, %v4171_v45 }
 0x2db   :  { %v3404_v12 = vpop.eup %3403  ;;  %3423 = vtanh.f32 %v4206_v32  ;;  %v1680_v39 = vadd.f32 1.0, %v3402_v7  ;;  %v1799_v32 = vmul.f32 %v4171_v45, %v4006_v36  ;;  %v1771_v45 = vsub.f32 1.0, %v4234_v31 }
 0x2dc   :  { %v3406_v49 = vpop.eup %3405  ;;  %3425 = vrcp.f32 %v1568_v16  ;;  %v1571_v50 = vadd.f32 1.0, %v3404_v12  ;;  %v1304_v20 = vadd.f32 %v4158_v33, %v4226_v5  ;;  %v1474_v19 = vadd.f32 %v4153_v27, %v4231_v13 }
 0x2dd   :  { %v3408_v30 = vpop.eup %3407  ;;  %3427 = vrcp.f32 %v1678_v1  ;;  %v1489_v3 = vadd.f32 %v4243_v53, %v4153_v27  ;;  %v1484_v31 = vadd.f32 %v4153_v27, %v4252_v18  ;;  %v1683_v23 = vadd.f32 1.0, %v3406_v49 }
 0x2de   :  { %v3410_v35 = vpop.eup %3409  ;;  %3429 = vrcp.f32 %v1571_v50  ;;  %v1570_v40 = vadd.f32 1.0, %v3408_v30  ;;  %v1319_v16 = vadd.f32 %v4239_v44, %v4158_v33  ;;  %v1314_v44 = vadd.f32 %v4158_v33, %v4245_v4  ;;  %v3460_v30 = vld [vmem:[#allocation2 + $0x30] sm:$0xff]  ;;  %v3462_v4 = vld [vmem:[#allocation2 + $0x48] sm:$0xff] }
 0x2df   :  { %v3412_v8 = vpop.eup %3411  ;;  %3431 = vrcp.f32 %v1681_v51  ;;  %v1682_v2 = vadd.f32 1.0, %v3410_v35 }
 0x2e0   :  { %v3414_v41 = vpop.eup %3413  ;;  %3433 = vrcp.f32 %v1570_v40  ;;  %v1781_v36 = vmul.f32 %v3412_v8, %v1765_v26 }
 0x2e1   :  { %v3416_v62 = vpop.eup %3415  ;;  %3435 = vrcp.f32 %v1680_v39  ;;  %v1780_v37 = vmul.f32 %v3414_v41, %v1764_v54  ;;  %v1802_v39 = vmul.f32 %v3460_v30, %v4247_v10  ;;  %v3473_v30 = vld [vmem:[%s4420_s2 + $0x28] sm:$0xff] }
 0x2e2   :  { %v3418_v43 = vpop.eup %3417  ;;  %3437 = vtanh.f32 %v4236_v25  ;;  %v1813_v46 = vadd.f32 %v1797_v59, %v1781_v36  ;;  %v1783_v48 = vmul.f32 %v3416_v62, %v1767_v47  ;;  %v1770_v59 = vsub.f32 1.0, %v4247_v10 }
 0x2e3   :  { %v3420_v63 = vpop.eup %3419  ;;  %3439 = vtanh.f32 %v4249_v52  ;;  %v1812_v56 = vadd.f32 %v1796_v9, %v1780_v37  ;;  %v1782_v5 = vmul.f32 %v3418_v43, %v1766_v11  ;;  %v1773_v11 = vsub.f32 1.0, %v4255_v57 }
 0x2e4   :  { %v3422_v6 = vpop.eup %3421  ;;  %3441 = vtanh.f32 %v4257_v24  ;;  %1829 = vst [vmem:[#allocation7 + $0x8] sm:$0xff] %v1813_v46  ;;  %v1815_v13 = vadd.f32 %v1799_v32, %v1783_v48  ;;  %v1785_v25 = vmul.f32 %v3420_v63, %v1769_v34  ;;  %v3464_v48 = vld [vmem:[#allocation2 + $0x50] sm:$0xff] }
 0x2e5   :  { %v3424_v38 = vpop.eup %3423  ;;  %3443 = vtanh.f32 %v4264_v42  ;;  %1828 = vst [vmem:[#allocation7] sm:$0xff] %v1812_v56  ;;  %v3138_v53 = vpack.c.bf16 %v1813_v46, %v1812_v56  ;;  %v1814_v61 = vadd.f32 %v1798_v28, %v1782_v5  ;;  %v1784_v60 = vmul.f32 %v3422_v6, %v1768_v22  ;;  %v3461_v22 = vld [vmem:[#allocation2 + $0x40] sm:$0xff]  ;;  %v3465_v5 = vld [vmem:[#allocation2 + $0x68] sm:$0xff] }
 0x2e6   :  { %v3426_v52 = vpop.eup %3425  ;;  %3445 = vtanh.f32 %v4272_v0  ;;  %1831 = vst [vmem:[#allocation7 + $0x18] sm:$0xff] %v1815_v13  ;;  %v1817_v27 = vadd.f32 %v1801_v15, %v1785_v25  ;;  %v1787_v18 = vmul.f32 %v3424_v38, %v1771_v45  ;;  %v1772_v28 = vsub.f32 1.0, %v4261_v55 }
 0x2e7   :  { %v4314_v14 = vpop.eup %3427  ;;  %3447 = vtanh.f32 %v4277_v21  ;;  %v1728_v24 = vmul.f32 %v3426_v52, %v1474_v19  ;;  %3139 = vmatprep.subr.bf16.mxu1 %v3138_v53  ;;  %1830 = vst [vmem:[#allocation7 + $0x10] sm:$0xff] %v1814_v61  ;;  %v3142_v1 = vpack.c.bf16 %v1815_v13, %v1814_v61  ;;  %v1816_v42 = vadd.f32 %v1800_v17, %v1784_v60  ;;  %v3463_v19 = vld [vmem:[#allocation2 + $0x58] sm:$0xff] }
 0x2e8   :  { %v3430_v7 = vpop.eup %3429  ;;  %3141 = vmatpush3.bf16.msra.mxu1 %v3138_v53  ;;  %1833 = vst [vmem:[#allocation7 + $0x28] sm:$0xff] %v1817_v27  ;;  %v1819_v26 = vadd.f32 %v1803_v29, %v1787_v18  ;;  %3449 = vrcp.f32 %v1683_v23  ;;  %v1804_v33 = vmul.f32 %v3461_v22, %v4261_v55  ;;  %v1805_v17 = vmul.f32 %v3462_v4, %v4255_v57 }
 0x2e9   :  { %v3432_v0 = vpop.eup %3431  ;;  %v1744_v12 = vadd.f32 %v1728_v24, %v1304_v20  ;;  %v1731_v51 = vmul.f32 %v3430_v7, %v1489_v3  ;;  %3143 = vmatprep.subr.bf16.mxu1 %v3142_v1  ;;  %1832 = vst [vmem:[#allocation7 + $0x20] sm:$0xff] %v1816_v42  ;;  %v3146_v54 = vpack.c.bf16 %v1817_v27, %v1816_v42  ;;  %3451 = vrcp.f32 %v1682_v2  ;;  %v3466_v2 = vld [vmem:[#allocation2 + $0x60] sm:$0xff]  ;;  %v3467_v7 = vld [vmem:[#allocation2 + $0x78] sm:$0xff] }
 0x2ea   :  { %v3434_v21 = vpop.eup %3433  ;;  %1835 = vst [vmem:[#allocation7 + $0x38] sm:$0xff] %v1819_v26  ;;  %v1775_v15 = vsub.f32 1.0, %v4269_v58  ;;  %v1774_v45 = vsub.f32 1.0, %v4314_v14  ;;  %v1807_v37 = vmul.f32 %v3463_v19, %v4269_v58  ;;  %v1777_v43 = vsub.f32 1.0, %v3432_v0  ;;  %v1952_v19 = vld [vmem:[%s4421_s3 + $0x18] sm:$0xff] }
 0x2eb   :  { %v4320_v49 = vpop.eup %3435  ;;  %3453 = vtanh.f32 %v1744_v12  ;;  %v1747_v50 = vadd.f32 %v1731_v51, %v1319_v16  ;;  %v1730_v9 = vmul.f32 %v3434_v21, %v1484_v31  ;;  %v1806_v63 = vmul.f32 %v3464_v48, %v4314_v14  ;;  %v3468_v51 = vld [vmem:[#allocation2 + $0x70] sm:$0xff] }
 0x2ec   :  { %v3438_v47 = vpop.eup %3437  ;;  %3145 = vmatpush3.bf16.msra.mxu1 %v3142_v1  ;;  %v1809_v6 = vmul.f32 %v3465_v5, %v3432_v0  ;;  %v1776_v38 = vsub.f32 1.0, %v4320_v49  ;;  %v1808_v27 = vmul.f32 %v3466_v2, %v4320_v49 }
 0x2ed   :  { %v3440_v32 = vpop.eup %3439  ;;  %3455 = vtanh.f32 %v1747_v50  ;;  %v1746_v35 = vadd.f32 %v1730_v9, %v1314_v44  ;;  %3147 = vmatprep.subr.bf16.mxu1 %v3146_v54  ;;  %v1786_v40 = vmul.f32 %v3438_v47, %v1770_v59  ;;  %v3469_v50 = vld [vmem:[%s4420_s2 + $0x8] sm:$0xff]  ;;  %v3470_v44 = vld [vmem:[%s4420_s2 + $0x10] sm:$0xff]  ;;  %v3471_v9 = vld [vmem:[%s4420_s2 + $0x18] sm:$0xff] }
 0x2ee   :  { %v3442_v34 = vpop.eup %3441  ;;  %v1789_v8 = vmul.f32 %v3440_v32, %v1773_v11  ;;  %v3472_v47 = vld [vmem:[%s4420_s2 + $0x20] sm:$0xff]  ;;  %v3475_v11 = vld [vmem:[%s4420_s2 + $0x38] sm:$0xff] }
 0x2ef   :  { %v3444_v10 = vpop.eup %3443  ;;  %3457 = vtanh.f32 %v1746_v35  ;;  %v1818_v41 = vadd.f32 %v1802_v39, %v1786_v40  ;;  %v1788_v36 = vmul.f32 %v3442_v34, %v1772_v28  ;;  %v3474_v39 = vld [vmem:[%s4420_s2 + $0x30] sm:$0xff]  ;;  %v1949_v32 = vld [vmem:[%s4421_s3] sm:$0xff] }
 0x2f0   :  { %v3446_v29 = vpop.eup %3445  ;;  %3149 = vmatpush3.bf16.msra.mxu1 %v3146_v54  ;;  %v1821_v62 = vadd.f32 %v1805_v17, %v1789_v8  ;;  %v1791_v20 = vmul.f32 %v3444_v10, %v1775_v15  ;;  %v1953_v35 = vld [vmem:[%s4421_s3 + $0x20] sm:$0xff]  ;;  %2918 = vmatprep.mubr.msk.f32.mxu0 %vm282_vm0, %v1949_v32 }
 0x2f1   :  { %v3448_v55 = vpop.eup %3447  ;;  %1834 = vst [vmem:[#allocation7 + $0x30] sm:$0xff] %v1818_v41  ;;  %v3150_v46 = vpack.c.bf16 %v1819_v26, %v1818_v41  ;;  %v1820_v57 = vadd.f32 %v1804_v33, %v1788_v36  ;;  %v1790_v3 = vmul.f32 %v3446_v29, %v1774_v45  ;;  %v1950_v45 = vld [vmem:[%s4421_s3 + $0x8] sm:$0xff] }
 0x2f2   :  { %1837 = vst [vmem:[#allocation7 + $0x48] sm:$0xff] %v1821_v62  ;;  %v1823_v56 = vadd.f32 %v1807_v37, %v1791_v20  ;;  %v1793_v31 = vmul.f32 %v3448_v55, %v1777_v43  ;;  %v3450_v23 = vpop.eup %3449  ;;  %v1954_v29 = vld [vmem:[%s4421_s3 + $0x28] sm:$0xff]  ;;  %v1955_v20 = vld [vmem:[%s4421_s3 + $0x30] sm:$0xff]  ;;  %v1956_v37 = vld [vmem:[%s4421_s3 + $0x38] sm:$0xff] }
 0x2f3   :  { %3151 = vmatprep.subr.bf16.mxu1 %v3150_v46  ;;  %1836 = vst [vmem:[#allocation7 + $0x40] sm:$0xff] %v1820_v57  ;;  %v3154_v13 = vpack.c.bf16 %v1821_v62, %v1820_v57  ;;  %v1822_v25 = vadd.f32 %v1806_v63, %v1790_v3  ;;  %v3452_v58 = vpop.eup %3451  ;;  %v1779_v18 = vsub.f32 1.0, %v3450_v23  ;;  %v1811_v16 = vmul.f32 %v3467_v7, %v3450_v23  ;;  %v1951_v62 = vld [vmem:[%s4421_s3 + $0x10] sm:$0xff] }
 0x2f4   :  { %3153 = vmatpush3.bf16.msra.mxu1 %v3150_v46  ;;  %1839 = vst [vmem:[#allocation7 + $0x58] sm:$0xff] %v1823_v56  ;;  %v1825_v53 = vadd.f32 %v1809_v6, %v1793_v31  ;;  %v1778_v1 = vsub.f32 1.0, %v3452_v58  ;;  %v1810_v54 = vmul.f32 %v3468_v51, %v3452_v58 }
 0x2f5   :  { %v3454_v61 = vpop.eup %3453  ;;  %3155 = vmatprep.subr.bf16.mxu1 %v3154_v13  ;;  %1838 = vst [vmem:[#allocation7 + $0x50] sm:$0xff] %v1822_v25  ;;  %v3158_v60 = vpack.c.bf16 %v1823_v56, %v1822_v25 }
 0x2f6   :  { %v1792_v52 = vmul.f32 %v3454_v61, %v1776_v38  ;;  %1841 = vst [vmem:[#allocation7 + $0x68] sm:$0xff] %v1825_v53 }
 0x2f7   :  { %v3456_v14 = vpop.eup %3455 }
 0x2f8   :  { %3157 = vmatpush3.bf16.msra.mxu1 %v3154_v13  ;;  %v1824_v24 = vadd.f32 %v1808_v27, %v1792_v52  ;;  %v1795_v42 = vmul.f32 %v3456_v14, %v1779_v18 }
 0x2f9   :  { %v3458_v26 = vpop.eup %3457  ;;  %3159 = vmatprep.subr.bf16.mxu1 %v3158_v60 }
 0x2fa   :  { %1840 = vst [vmem:[#allocation7 + $0x60] sm:$0xff] %v1824_v24  ;;  %v3162_v0 = vpack.c.bf16 %v1825_v53, %v1824_v24  ;;  %v1794_v12 = vmul.f32 %v3458_v26, %v1778_v1  ;;  %v1827_v21 = vadd.f32 %v1811_v16, %v1795_v42 }
 0x2fc   :  { %3161 = vmatpush3.bf16.msra.mxu1 %v3158_v60  ;;  %v1826_v59 = vadd.f32 %v1810_v54, %v1794_v12  ;;  %1843 = vst [vmem:[#allocation7 + $0x78] sm:$0xff] %v1827_v21 }
 0x2fd   :  { %3163 = vmatprep.subr.bf16.mxu1 %v3162_v0 }
 0x2fe   :  { %1842 = vst [vmem:[#allocation7 + $0x70] sm:$0xff] %v1826_v59  ;;  %v3166_v49 = vpack.c.bf16 %v1827_v21, %v1826_v59 }
 0x300   :  { %3165 = vmatpush3.bf16.msra.mxu1 %v3162_v0 }
 0x301   :  { %3167 = vmatprep.subr.bf16.mxu1 %v3166_v49 }
 0x304   :  { %3169 = vmatpush3.bf16.msra.mxu1 %v3166_v49 }
 0x307   :  { %2891 = vmatmul.mubr.f32.vlgmr.msra.gmra.mrb[32].mxu1 %v3469_v50 }
 0x308   :  { %2893 = vmatprep.mubr.f32.mxu1 %v3470_v44 }
 0x30b   :  { %2894 = vmatmul.mubr.f32.gmra.mrb[34].mxu1 %v3471_v9 }
 0x30c   :  { %2896 = vmatprep.mubr.f32.mxu1 %v3472_v47 }
 0x30f   :  { %2897 = vmatmul.mubr.f32.gmra.mrb[36].mxu1 %v3473_v30 }
 0x310   :  { %2899 = vmatprep.mubr.f32.mxu1 %v3474_v39 }
 0x313   :  { %2900 = vmatmul.mubr.f32.gmra.mrb[38].mxu1 %v3475_v11 }
 0x314   :  { %2924 = vmatprep.mubr.msk.f32.mxu1 %vm282_vm0, %v1953_v35 }
 0x3da   :  { %v2892_v40 = vpop.f32.mrb[32].mxu1 }
 0x3db   :  { %v1910_v28 = vpop.f32.mrb[33].mxu1 }
 0x3dc   :  { %v3170_v34 = vpack.c.bf16 %v2892_v40, %v1910_v28 }
 0x3de   :  { %3171 = vmatprep.subr.bf16.mxu0 %v3170_v34  ;;  %3186 = vmatprep.subr.bf16.mxu1 %v3170_v34  ;;  %v2895_v8 = vpop.f32.mrb[34].mxu1 }
 0x3df   :  { %3173 = vmatpush3.bf16.msra.mxu0 %v3170_v34  ;;  %3190 = vmatpush3.bf16.msra.mxu1 %v3170_v34  ;;  %v1920_v22 = vpop.f32.mrb[35].mxu1 }
 0x3e0   :  { %v3174_v33 = vpack.c.bf16 %v2895_v8, %v1920_v22 }
 0x3e2   :  { %3175 = vmatprep.subr.bf16.mxu0 %v3174_v33  ;;  %3187 = vmatprep.subr.bf16.mxu1 %v3174_v33  ;;  %v2898_v4 = vpop.f32.mrb[36].mxu1 }
 0x3e3   :  { %3177 = vmatpush3.bf16.msra.mxu0 %v3174_v33  ;;  %3191 = vmatpush3.bf16.msra.mxu1 %v3174_v33  ;;  %v1930_v17 = vpop.f32.mrb[37].mxu1 }
 0x3e4   :  { %v3178_v15 = vpack.c.bf16 %v2898_v4, %v1930_v17 }
 0x3e6   :  { %3179 = vmatprep.subr.bf16.mxu0 %v3178_v15  ;;  %3188 = vmatprep.subr.bf16.mxu1 %v3178_v15  ;;  %v2901_v10 = vpop.f32.mrb[38].mxu1 }
 0x3e7   :  { %3181 = vmatpush3.bf16.msra.mxu0 %v3178_v15  ;;  %3192 = vmatpush3.bf16.msra.mxu1 %v3178_v15  ;;  %v1940_v41 = vpop.f32.mrb[39].mxu1 }
 0x3e8   :  { %v3182_v36 = vpack.c.bf16 %v2901_v10, %v1940_v41 }
 0x3ea   :  { %3183 = vmatprep.subr.bf16.mxu0 %v3182_v36  ;;  %3189 = vmatprep.subr.bf16.mxu1 %v3182_v36 }
 0x3eb   :  { %3185 = vmatpush3.bf16.msra.mxu0 %v3182_v36  ;;  %3193 = vmatpush3.bf16.msra.mxu1 %v3182_v36 }
 0x3ee   :  { %2919 = vmatmul.mubr.msk.f32.vlgmr.msra.gmra.mrb[48].mxu0 %vm282_vm0, %v1950_v45  ;;  %2925 = vmatmul.mubr.msk.f32.vlgmr.msra.gmra.mrb[40].mxu1 %vm282_vm0, %v1954_v29 }
 0x3ef   :  { %2921 = vmatprep.mubr.msk.f32.mxu0 %vm282_vm0, %v1951_v62  ;;  %2927 = vmatprep.mubr.msk.f32.mxu1 %vm282_vm0, %v1955_v20 }
 0x3f2   :  { %2922 = vmatmul.mubr.msk.f32.gmra.mrb[50].mxu0 %vm282_vm0, %v1952_v19  ;;  %2928 = vmatmul.mubr.msk.f32.gmra.mrb[42].mxu1 %vm282_vm0, %v1956_v37 }
 0x3f3   :  { %3531 = shalt.err (!%p3528_p6)
}
 0x3f4   :  { %s3532_s25 = scalar_lea.hbm %s4427_s9, 2048 }
 0x3f5   :  { %p3533_p7 = scmp.ne.s32.totalorder %s4427_s9, %s3532_s25  ;;  %p3536_p8 = scmp.lt.u32.totalorder %s3532_s25, %s4427_s9 }
 0x3f7   :  { %p3538_p9 = pnand %p3536_p8, %p3533_p7 }
 0x3f9   :  { %3541 = shalt.err (!%p3538_p9)
}
 0x3fa   :  { %2105 = dma.vmem_to_hbm [thread:$0]  %s2100_s20, 2048, %s4427_s9, [#allocation4], %s3573_s23, %s3573_s23, %s3574_s24  }
 0x3fb   :  { %s3578_s28 = smov [#allocation8]  }
 0x3fc   :  { %s2111_s29 = sshll.u32 %s3578_s28, 4  ;;  %s2112_s29 = int_to_ptr.vmem [resolvable:$true] %s2111_s29 }
 0x3fd   :  { %s3542_s9 = scalar_lea.vmem %s2112_s29, 1024  ;;  %p3547_p11 = scmp.lt.s32.totalorder %s2112_s29, %s2112_s29 }
 0x3fe   :  { %p3543_p10 = scmp.ne.s32.totalorder %s2112_s29, %s3542_s9  ;;  %p3548_p12 = scmp.lt.s32.totalorder %s3542_s9, %s3542_s9 }
 0x400   :  { %p3549_p13 = por %p3548_p12, %p3547_p11 }
 0x402   :  { %p3550_p0 = pnand %p3549_p13, %p3543_p10 }
 0x4c1   :  { %v2920_v43 = vpop.f32.mrb[48].mxu0  ;;  %v2926_v55 = vpop.f32.mrb[40].mxu1 }
 0x4c2   :  { %2087 = vst [vmem:[#allocation8 + $0x8] sm:$0xff] %v2920_v43  ;;  %2091 = vst [vmem:[#allocation8 + $0x28] sm:$0xff] %v2926_v55  ;;  %v2047_v46 = vpop.f32.mrb[49].mxu0  ;;  %v2067_v57 = vpop.f32.mrb[41].mxu1 }
 0x4c3   :  { %2086 = vst [vmem:[#allocation8] sm:$0xff] %v2047_v46  ;;  %2090 = vst [vmem:[#allocation8 + $0x20] sm:$0xff] %v2067_v57 }
 0x4c5   :  { %v2923_v3 = vpop.f32.mrb[50].mxu0  ;;  %v2929_v48 = vpop.f32.mrb[42].mxu1 }
 0x4c6   :  { %2089 = vst [vmem:[#allocation8 + $0x18] sm:$0xff] %v2923_v3  ;;  %2093 = vst [vmem:[#allocation8 + $0x38] sm:$0xff] %v2929_v48  ;;  %v2057_v63 = vpop.f32.mrb[51].mxu0  ;;  %v2077_v56 = vpop.f32.mrb[43].mxu1 }
 0x4c7   :  { %2088 = vst [vmem:[#allocation8 + $0x10] sm:$0xff] %v2057_v63  ;;  %2092 = vst [vmem:[#allocation8 + $0x30] sm:$0xff] %v2077_v56 }
 0x4c8   :  { %3553 = shalt.err (!%p3550_p0)
}
 0x4c9   :  { %s3554_s11 = scalar_lea.hbm %s4428_s10, 1024 }
 0x4ca   :  { %p3555_p1 = scmp.ne.s32.totalorder %s4428_s10, %s3554_s11  ;;  %p3558_p2 = scmp.lt.u32.totalorder %s3554_s11, %s4428_s10 }
 0x4cc   :  { %p3560_p3 = pnand %p3558_p2, %p3555_p1 }
 0x4ce   :  { %3563 = shalt.err (!%p3560_p3)
}
 0x4cf   :  { %2117 = dma.vmem_to_hbm [thread:$0]  %s2112_s29, 1024, %s4428_s10, [#allocation9], %s3573_s23, %s3573_s23, %s3574_s24  }
 0x4d0   :  { %3568 = dma.done.wait [#allocation4], 2048  }
 0x4d1   :  { %3569 = vsyncadd [#allocation4], 4294965248 }
 0x4d2   :  { %3570 = dma.done.wait [#allocation9], 1024  }
 0x4d3   :  { %3571 = vsyncadd [#allocation9], 4294966272 }
 0x4d4   :  { %2124 = vsyncpa [#allocation3], 1 }
 0x4d5   :  { %2125 = vsyncpa [#allocation6], 1 }
 0x4d6   :  { %2126 = vsyncpa [#allocation4], 1 }
 0x4d7   :  { %2127 = vsyncpa [#allocation9], 1 }

</bundles_post_ra>
